<compile_context>
chip_gen: v7x
topology: tpu7x:2x2x1
jax: 0.10.0
libtpu: 0.0.40
codegen_flags: <defaults>
</compile_context>

<pallas_src>
import jax
import jax.numpy as jnp
from jax.experimental import pallas as pl
from jax.experimental.pallas import tpu as pltpu


# -----------------------------------------------------------------------------
# Plain-JAX glue (data-dependent neighbor search / upsampling; feeds the kernels)
# -----------------------------------------------------------------------------
def ball_query(xyz, new_xyz, radius, k):
    """pointnet2-style ball query: first k points (in index order) within
    `radius` of each center; unfilled slots repeat the first valid index.
    Returns nbr_idx (bs, k, p1) int32 — k-first layout so per-tile index blocks
    are lane-dense without an extra XLA transpose — and is_filled (bs, k, p1)."""
    # TODO(synk): O(p^2) search in plain JAX; use a tiled / hashed search for large p.
    p0 = xyz.shape[1]
    d2 = jnp.sum((new_xyz[:, None, :, :] - xyz[:, :, None, :]) ** 2, axis=-1)  # (bs, p0, p1)
    within = d2 < radius * radius
    cand = jnp.where(within, jnp.arange(p0, dtype=jnp.int32)[None, :, None], p0)
    cand = jnp.sort(cand, axis=1)[:, :k, :]                  # (bs, k, p1)
    is_filled = cand < p0
    first = cand[:, :1, :]                   # center itself is always in its ball
    nbr_idx = jnp.where(is_filled, cand, first).astype(jnp.int32)
    return nbr_idx, is_filled


def point_upsample_linear(xyz, parent_xyz, data, eps=1e-8):
    """'linear' PointUpsample: inverse-squared-distance weighted 3-NN interpolation
    from the coarse set `xyz` onto `parent_xyz`.
    TODO(synk): PointUpsample is not defined in the provided spec; this follows the
    standard pointnet2 three_nn / three_interpolate scheme for up='linear'."""
    d2 = jnp.sum((parent_xyz[:, :, None, :] - xyz[:, None, :, :]) ** 2, axis=-1)  # (bs,p1,p0)
    neg_d2, nn_idx = jax.lax.top_k(-d2, 3)                                        # (bs,p1,3)
    w = 1.0 / (-neg_d2 + eps)
    w = w / jnp.sum(w, axis=-1, keepdims=True)
    gathered = jax.vmap(lambda f, idx: f[:, idx])(data, nn_idx)                   # (bs,c,p1,3)
    return jnp.sum(gathered * w[:, None, :, :], axis=-1)


def _bf16x3_stack(x):
    """3-way bf16 split of f32 features, stacked along channels:
    (bs, c, p) f32 -> (bs, 3c, p) bf16 with x ~= hi + mid + lo (f32-accurate).
    Computed ONCE in the wrapper (hoisted out of the per-tile grid loop)."""
    hi = x.astype(jnp.bfloat16)
    r = x - hi.astype(jnp.float32)
    mid = r.astype(jnp.bfloat16)
    lo = (r - mid.astype(jnp.float32)).astype(jnp.bfloat16)
    return jnp.concatenate([hi, mid, lo], axis=1)


def _choose_tp(p, bs, tp_max=512, min_steps=4):
    """Largest lane-dense tile (multiple of 128 dividing p, <= tp_max) that still
    gives the pipeline / both megacore TCs at least `min_steps` grid steps."""
    assert p % 128 == 0, "point count must be a multiple of 128"
    best = None
    for tp in range(min(tp_max, p), 127, -128):
        if p % tp:
            continue
        if best is None:
            best = tp
        if bs * (p // tp) >= min_steps:
            return tp
    return best if best is not None else 128


# -----------------------------------------------------------------------------
# In-kernel helpers
# -----------------------------------------------------------------------------
def _gather_max(split_ref, idx_ref):
    """fmax[c, i] = max_s feats[c, idx[s, i]].

    One-hot MXU gather from the VMEM-resident, pre-split per-batch features
    (split_ref: (3c, p) bf16 = [hi; mid; lo]).  One dot per neighbor with
    M = 3c rows; the three c-row slabs are summed in f32 to reconstruct the
    gathered values (0/1 one-hot is exact in bf16).  Rolled fori_loop keeps a
    single (p, tp) one-hot live at a time (bounded VMEM on v5e/v7x)."""
    three_c, p = split_ref.shape
    c = three_c // 3
    k, tp = idx_ref.shape
    split = split_ref[...]                                     # loop-invariant (3c, p) bf16
    rows = jax.lax.broadcasted_iota(jnp.int32, (p, 1), 0)      # (p, 1): no (p, tp) iota temp

    def body(s, fmax):
        idx_row = idx_ref[pl.ds(s, 1), :]                      # (1, tp) int32, dynamic row s
        onehot = (rows == idx_row).astype(jnp.bfloat16)        # (p, tp) 0/1
        g3 = jnp.dot(split, onehot, preferred_element_type=jnp.float32)   # (3c, tp) f32
        g = g3[:c] + (g3[c:2 * c] + g3[2 * c:])                # reconstruct gathered f32
        return jnp.maximum(fmax, g)

    init = jnp.full((c, tp), -jnp.inf, dtype=jnp.float32)
    return jax.lax.fori_loop(0, k, body, init)


# -----------------------------------------------------------------------------
# Pallas kernels
# -----------------------------------------------------------------------------
def mrconv_kernel_stage1(idx_ref, fi_ref, split_ref, w1r_ref, w2_ref, b_ref,
                         out_ref, res_ref):
    # idx_ref  : (k, tp) int32       neighbor indices for this point tile
    # fi_ref   : (c_in, tp) f32      center features for this tile
    # split_ref: (3*c_in, p) bf16    per-batch bf16x3-stacked gather source (resident)
    # w1r_ref  : (2*c_out, c_in)     [W1 ; W_res] stacked -> one dot gives both
    # w2_ref   : (c_out, c_in)       W[:, c_in:] (acts on max-relative part)
    # b_ref    : (c_out, 1)
    c_out = out_ref.shape[0]
    fi = fi_ref[...]
    fmax = _gather_max(split_ref, idx_ref)
    rel = fmax - fi                                            # == max_s (fj_s - fi)
    t = jnp.dot(w1r_ref[...], fi, preferred_element_type=jnp.float32)  # (2*c_out, tp)
    out = t[:c_out] + jnp.dot(w2_ref[...], rel, preferred_element_type=jnp.float32) + b_ref[...]
    out_ref[...] = jnp.maximum(out, 0.0).astype(out_ref.dtype)          # ReLU
    res_ref[...] = t[c_out:].astype(res_ref.dtype)                       # W_res @ fi


def mrconv_kernel_stage2(idx_ref, fi_ref, split_ref, w1_ref, w2_ref, b_ref,
                         resin_ref, out_ref):
    fi = fi_ref[...]
    fmax = _gather_max(split_ref, idx_ref)
    rel = fmax - fi
    out = (jnp.dot(w1_ref[...], fi, preferred_element_type=jnp.float32)
           + jnp.dot(w2_ref[...], rel, preferred_element_type=jnp.float32)
           + b_ref[...] + resin_ref[...])
    out_ref[...] = jnp.maximum(out, 0.0).astype(out_ref.dtype)           # ReLU(conv + res)


# -----------------------------------------------------------------------------
# pallas_call wrappers
# -----------------------------------------------------------------------------
def mrconv_stage1(feats, nbr_idx, w1, w2, b, wr, *, tp):
    bs, c_in, p = feats.shape
    c_out = w1.shape[0]
    k = nbr_idx.shape[1]
    assert p % tp == 0 and tp % 128 == 0
    split = _bf16x3_stack(feats)                      # (bs, 3*c_in, p) bf16, hoisted split
    w1r = jnp.concatenate([w1, wr], axis=0)           # (2*c_out, c_in) fused fi-weights
    out_spec = pl.BlockSpec((None, c_out, tp), lambda b_, j: (b_, 0, j))
    return pl.pallas_call(
        mrconv_kernel_stage1,
        out_shape=(jax.ShapeDtypeStruct((bs, c_out, p), feats.dtype),
                   jax.ShapeDtypeStruct((bs, c_out, p), feats.dtype)),
        grid_spec=pltpu.PrefetchScalarGridSpec(
            num_scalar_prefetch=0,
            grid=(bs, p // tp),
            in_specs=[
                pl.BlockSpec((None, k, tp), lambda b_, j: (b_, 0, j)),       # idx tile
                pl.BlockSpec((None, c_in, tp), lambda b_, j: (b_, 0, j)),    # fi tile
                pl.BlockSpec((None, 3 * c_in, p), lambda b_, j: (b_, 0, 0)), # gather source (resident)
                pl.BlockSpec((2 * c_out, c_in), lambda b_, j: (0, 0)),       # [W1 ; W_res]
                pl.BlockSpec((c_out, c_in), lambda b_, j: (0, 0)),           # W2
                pl.BlockSpec((c_out, 1), lambda b_, j: (0, 0)),              # bias
            ],
            out_specs=(out_spec, out_spec)),
        compiler_params=pltpu.CompilerParams(
            dimension_semantics=("parallel", "arbitrary")),   # batch across cores; tiles revisit
    )(nbr_idx, feats, split, w1r, w2, b)


def mrconv_stage2(feats, nbr_idx, w1, w2, b, res, *, tp):
    bs, c_in, p = feats.shape
    c_out = w1.shape[0]
    k = nbr_idx.shape[1]
    assert p % tp == 0 and tp % 128 == 0
    split = _bf16x3_stack(feats)                      # (bs, 3*c_in, p) bf16, hoisted split
    out_spec = pl.BlockSpec((None, c_out, tp), lambda b_, j: (b_, 0, j))
    return pl.pallas_call(
        mrconv_kernel_stage2,
        out_shape=jax.ShapeDtypeStruct((bs, c_out, p), feats.dtype),
        grid_spec=pltpu.PrefetchScalarGridSpec(
            num_scalar_prefetch=0,
            grid=(bs, p // tp),
            in_specs=[
                pl.BlockSpec((None, k, tp), lambda b_, j: (b_, 0, j)),       # idx tile
                pl.BlockSpec((None, c_in, tp), lambda b_, j: (b_, 0, j)),    # fi tile
                pl.BlockSpec((None, 3 * c_in, p), lambda b_, j: (b_, 0, 0)), # gather source (resident)
                pl.BlockSpec((c_out, c_in), lambda b_, j: (0, 0)),           # W1
                pl.BlockSpec((c_out, c_in), lambda b_, j: (0, 0)),           # W2
                pl.BlockSpec((c_out, 1), lambda b_, j: (0, 0)),              # bias
                pl.BlockSpec((None, c_out, tp), lambda b_, j: (b_, 0, j)),   # residual tile
            ],
            out_specs=out_spec),
        compiler_params=pltpu.CompilerParams(
            dimension_semantics=("parallel", "arbitrary")),
    )(nbr_idx, feats, split, w1, w2, b, res)


def mrconv_up_block_forward(xyz, parent_xyz, feats, params, *, k=8, radius=0.25,
                            tp_max=512):
    """MRConvUpBlock.forward (scale_factor=1, aggregate='max', norm=None,
    actv='relu', bias=True, res=True, up='linear')."""
    w1f, b1 = params["conv1_w"], params["conv1_b"]     # (c1, 2*c0), (c1,)
    w2f, b2 = params["conv2_w"], params["conv2_b"]     # (c1, 2*c1), (c1,)
    wr = params.get("res_w")                           # (c1, c0) or None (Identity)
    bs, c0, p0 = feats.shape
    c1 = w1f.shape[0]
    p1 = parent_xyz.shape[1]
    if wr is None:
        assert c1 == c0, "res_conv is Identity only when out_dim == in_dim"
        wr = jnp.eye(c1, c0, dtype=feats.dtype)

    tp1 = _choose_tp(p0, bs, tp_max=tp_max)            # e.g. 256 at p0=512, bs=2
    tp2 = _choose_tp(p1, bs, tp_max=tp_max)            # e.g. 512 at p1=1024, bs=2

    # --- stage 1: MRConv on the input point set (grouper1, conv1, ReLU, res_conv) ---
    nbr1, _ = ball_query(xyz, xyz, radius, k)          # (bs, k, p0); is_filled unused for 'max'
    f1, res = mrconv_stage1(feats, nbr1,
                            w1f[:, :c0], w1f[:, c0:], b1.reshape(c1, 1), wr, tp=tp1)

    # --- upsample [feats ; res] jointly to the parent point set -----------------------
    data = jnp.concatenate([f1, res], axis=1)                       # (bs, 2*c1, p0)
    data = point_upsample_linear(xyz, parent_xyz, data)             # (bs, 2*c1, p1)
    f_up, res_up = data[:, :c1], data[:, c1:]

    # --- stage 2: MRConv on the parent point set (grouper2, conv2, +res, ReLU) --------
    nbr2, _ = ball_query(parent_xyz, parent_xyz, radius, k)
    out = mrconv_stage2(f_up, nbr2,
                        w2f[:, :c1], w2f[:, c1:], b2.reshape(c1, 1), res_up, tp=tp2)

    aux = dict(nbr1=nbr1, nbr2=nbr2, f1=f1, res=res, f_up=f_up, res_up=res_up)
    return parent_xyz, out, aux


# -----------------------------------------------------------------------------
# Pure-JAX references (mirror the PyTorch forward) for correctness checks
# -----------------------------------------------------------------------------
def _mrconv_cat_ref(feats, nbr_idx):
    fi = feats                                                     # (bs,c,p)
    fj = jax.vmap(lambda f, idx: f[:, idx])(feats, nbr_idx)        # (bs,c,k,p)
    f = jnp.max(fj - fi[:, :, None, :], axis=2)
    return jnp.concatenate([fi, f], axis=1)                        # (bs,2c,p)


def stage1_ref(feats, nbr_idx, w_full, b, wr):
    cat = _mrconv_cat_ref(feats, nbr_idx)
    out = jnp.einsum("oc,bcp->bop", w_full, cat) + b[None, :, None]
    return jnp.maximum(out, 0.0), jnp.einsum("oc,bcp->bop", wr, feats)


def stage2_ref(feats, nbr_idx, w_full, b, res):
    cat = _mrconv_cat_ref(feats, nbr_idx)
    out = jnp.einsum("oc,bcp->bop", w_full, cat) + b[None, :, None] + res
    return jnp.maximum(out, 0.0)


# -----------------------------------------------------------------------------
if __name__ == "__main__":
    key = jax.random.PRNGKey(0)
    bs, c0, c1 = 2, 8, 16          # in_dim, out_dim
    p0, p1 = 512, 1024             # coarse / parent (fine) point counts
    k, radius = 8, 0.25

    keys = jax.random.split(key, 8)
    xyz = jax.random.uniform(keys[0], (bs, p0, 3), jnp.float32)
    parent_xyz = jax.random.uniform(keys[1], (bs, p1, 3), jnp.float32)
    feats = jax.random.normal(keys[2], (bs, c0, p0), jnp.float32)

    def uinit(kk, shape, fan_in):
        bound = 1.0 / (fan_in ** 0.5)
        return jax.random.uniform(kk, shape, jnp.float32, -bound, bound)

    params = dict(
        conv1_w=uinit(keys[3], (c1, 2 * c0), 2 * c0),   # Conv2d(2*c0 -> c1, 1x1)
        conv1_b=uinit(keys[4], (c1,), 2 * c0),
        conv2_w=uinit(keys[5], (c1, 2 * c1), 2 * c1),   # Conv2d(2*c1 -> c1, 1x1)
        conv2_b=uinit(keys[6], (c1,), 2 * c1),
        res_w=uinit(keys[7], (c1, c0), c0),             # Conv1d(c0 -> c1, 1, bias=False)
    )

    xyz_out, feats_out, aux = mrconv_up_block_forward(
        xyz, parent_xyz, feats, params, k=k, radius=radius)
    feats_out = jax.block_until_ready(feats_out)
    assert xyz_out.shape == (bs, p1, 3)
    assert feats_out.shape == (bs, c1, p1)

    # Validate each Pallas call against a pure-JAX reference given the same inputs.
    ref_f1, ref_res = stage1_ref(feats, aux["nbr1"], params["conv1_w"],
                                 params["conv1_b"], params["res_w"])
    assert jnp.allclose(aux["f1"], ref_f1, atol=1e-4, rtol=1e-4), "stage-1 conv mismatch"
    assert jnp.allclose(aux["res"], ref_res, atol=1e-4, rtol=1e-4), "stage-1 residual mismatch"

    ref_out = stage2_ref(aux["f_up"], aux["nbr2"], params["conv2_w"],
                         params["conv2_b"], aux["res_up"])
    assert jnp.allclose(feats_out, ref_out, atol=1e-4, rtol=1e-4), "stage-2 mismatch"

    print("KERNEL_OK")
</pallas_src>

<mosaic_0001>
module attributes {stable_mosaic.version = 11 : i64} {
  func.func @mrconv_kernel_stage1(%arg0: i32, %arg1: i32, %arg2: memref<1x8x256xi32, #tpu.memory_space<vmem>>, %arg3: memref<1x8x256xf32, #tpu.memory_space<vmem>>, %arg4: memref<1x24x512xbf16, #tpu.memory_space<vmem>>, %arg5: memref<32x8xf32, #tpu.memory_space<vmem>>, %arg6: memref<16x8xf32, #tpu.memory_space<vmem>>, %arg7: memref<16x1xf32, #tpu.memory_space<vmem>>, %arg8: memref<1x16x256xf32, #tpu.memory_space<vmem>>, %arg9: memref<1x16x256xf32, #tpu.memory_space<vmem>>) attributes {dimension_semantics = [#tpu.dimension_semantics<parallel>, #tpu.dimension_semantics<arbitrary>], iteration_bounds = array<i64: 2, 2>, scalar_prefetch = 0 : i64, scratch_operands = 0 : i64, tpu.core_type = #tpu.core_type<tc>, window_params = [{transform_indices = @transform_0, window_bounds = array<i64: 1, 8, 256>}, {transform_indices = @transform_1, window_bounds = array<i64: 1, 8, 256>}, {transform_indices = @transform_2, window_bounds = array<i64: 1, 24, 512>}, {pipeline_mode = #tpu.pipeline_mode<synchronous>, transform_indices = @transform_3, window_bounds = array<i64: 32, 8>}, {pipeline_mode = #tpu.pipeline_mode<synchronous>, transform_indices = @transform_4, window_bounds = array<i64: 16, 8>}, {pipeline_mode = #tpu.pipeline_mode<synchronous>, transform_indices = @transform_5, window_bounds = array<i64: 16, 1>}, {transform_indices = @transform_6, window_bounds = array<i64: 1, 16, 256>}, {transform_indices = @transform_7, window_bounds = array<i64: 1, 16, 256>}]} {
    %c0 = arith.constant 0 : index
    %c0_0 = arith.constant 0 : index
    %c0_1 = arith.constant 0 : index
    %0 = vector.load %arg3[%c0, %c0_0, %c0_1] : memref<1x8x256xf32, #tpu.memory_space<vmem>>, vector<1x8x256xf32>
    %1 = vector.shape_cast %0 : vector<1x8x256xf32> to vector<8x256xf32>
    %c0_2 = arith.constant 0 : index
    %c0_3 = arith.constant 0 : index
    %c0_4 = arith.constant 0 : index
    %2 = vector.load %arg4[%c0_2, %c0_3, %c0_4] : memref<1x24x512xbf16, #tpu.memory_space<vmem>>, vector<1x24x512xbf16>
    %3 = vector.shape_cast %2 : vector<1x24x512xbf16> to vector<24x512xbf16>
    %4 = tpu.iota {dimensions = array<i32: 0>} : vector<512x1xi32>
    %cst = arith.constant 0xFF800000 : f32
    %5 = vector.broadcast %cst : f32 to vector<8x256xf32>
    %c0_i32 = arith.constant 0 : i32
    %c8_i32 = arith.constant 8 : i32
    %6 = arith.addi %c0_i32, %c8_i32 : i32
    %c1_i32 = arith.constant 1 : i32
    %7 = scf.for %arg10 = %c0_i32 to %6 step %c1_i32 iter_args(%arg11 = %5) -> (vector<8x256xf32>)  : i32 {
      %c0_21 = arith.constant 0 : index
      %27 = arith.index_cast %arg10 : i32 to index
      %c0_22 = arith.constant 0 : index
      %28 = vector.load %arg2[%c0_21, %27, %c0_22] : memref<1x8x256xi32, #tpu.memory_space<vmem>>, vector<1x1x256xi32>
      %29 = vector.shape_cast %28 : vector<1x1x256xi32> to vector<1x256xi32>
      %30 = vector.broadcast %4 : vector<512x1xi32> to vector<512x256xi32>
      %31 = vector.broadcast %29 : vector<1x256xi32> to vector<512x256xi32>
      %32 = arith.cmpi eq, %30, %31 : vector<512x256xi32>
      %33 = arith.extui %32 : vector<512x256xi1> to vector<512x256xi32>
      %34 = arith.sitofp %33 : vector<512x256xi32> to vector<512x256xf32>
      %35 = arith.truncf %34 : vector<512x256xf32> to vector<512x256xbf16>
      %cst_23 = arith.constant dense<0.000000e+00> : vector<24x256xf32>
      %36 = tpu.matmul %3, %35, %cst_23 {dimension_numbers = #tpu.dot_dimension_numbers<[1], [0], [0], [1], [0, 0, 1, 1], [], []>} : vector<24x512xbf16>, vector<512x256xbf16>, vector<24x256xf32> -> vector<24x256xf32>
      %37 = vector.extract_strided_slice %36 {offsets = [0, 0], sizes = [8, 256], strides = [1, 1]} : vector<24x256xf32> to vector<8x256xf32>
      %38 = vector.extract_strided_slice %36 {offsets = [8, 0], sizes = [8, 256], strides = [1, 1]} : vector<24x256xf32> to vector<8x256xf32>
      %39 = vector.extract_strided_slice %36 {offsets = [16, 0], sizes = [8, 256], strides = [1, 1]} : vector<24x256xf32> to vector<8x256xf32>
      %40 = arith.addf %38, %39 : vector<8x256xf32>
      %41 = arith.addf %37, %40 : vector<8x256xf32>
      %42 = arith.maximumf %arg11, %41 : vector<8x256xf32>
      scf.yield %42 : vector<8x256xf32>
    }
    %c8_i32_5 = arith.constant 8 : i32
    %8 = arith.subf %7, %1 : vector<8x256xf32>
    %c0_6 = arith.constant 0 : index
    %c0_7 = arith.constant 0 : index
    %9 = vector.load %arg5[%c0_6, %c0_7] : memref<32x8xf32, #tpu.memory_space<vmem>>, vector<32x8xf32>
    %cst_8 = arith.constant dense<0.000000e+00> : vector<32x256xf32>
    %10 = tpu.matmul %9, %1, %cst_8 {dimension_numbers = #tpu.dot_dimension_numbers<[1], [0], [0], [1], [0, 0, 1, 1], [], []>} : vector<32x8xf32>, vector<8x256xf32>, vector<32x256xf32> -> vector<32x256xf32>
    %11 = vector.extract_strided_slice %10 {offsets = [0, 0], sizes = [16, 256], strides = [1, 1]} : vector<32x256xf32> to vector<16x256xf32>
    %c0_9 = arith.constant 0 : index
    %c0_10 = arith.constant 0 : index
    %12 = vector.load %arg6[%c0_9, %c0_10] : memref<16x8xf32, #tpu.memory_space<vmem>>, vector<16x8xf32>
    %cst_11 = arith.constant dense<0.000000e+00> : vector<16x256xf32>
    %13 = tpu.matmul %12, %8, %cst_11 {dimension_numbers = #tpu.dot_dimension_numbers<[1], [0], [0], [1], [0, 0, 1, 1], [], []>} : vector<16x8xf32>, vector<8x256xf32>, vector<16x256xf32> -> vector<16x256xf32>
    %14 = arith.addf %11, %13 : vector<16x256xf32>
    %c0_12 = arith.constant 0 : index
    %c0_13 = arith.constant 0 : index
    %15 = vector.load %arg7[%c0_12, %c0_13] : memref<16x1xf32, #tpu.memory_space<vmem>>, vector<16x1xf32>
    %16 = vector.broadcast %15 : vector<16x1xf32> to vector<16x256xf32>
    %17 = arith.addf %14, %16 : vector<16x256xf32>
    %cst_14 = arith.constant 0.000000e+00 : f32
    %18 = vector.broadcast %cst_14 : f32 to vector<16x256xf32>
    %19 = arith.maximumf %17, %18 : vector<16x256xf32>
    %c0_15 = arith.constant 0 : index
    %c0_16 = arith.constant 0 : index
    %c0_17 = arith.constant 0 : index
    %20 = vector.load %arg8[%c0_15, %c0_16, %c0_17] : memref<1x16x256xf32, #tpu.memory_space<vmem>>, vector<1x16x256xf32>
    %21 = vector.shape_cast %20 : vector<1x16x256xf32> to vector<16x256xf32>
    %22 = vector.shape_cast %19 : vector<16x256xf32> to vector<1x16x256xf32>
    tpu.vector_store %arg8[%c0_15, %c0_16, %c0_17], %22 {strides = array<i32>} : memref<1x16x256xf32, #tpu.memory_space<vmem>>, vector<1x16x256xf32>,
    %23 = vector.extract_strided_slice %10 {offsets = [16, 0], sizes = [16, 256], strides = [1, 1]} : vector<32x256xf32> to vector<16x256xf32>
    %c0_18 = arith.constant 0 : index
    %c0_19 = arith.constant 0 : index
    %c0_20 = arith.constant 0 : index
    %24 = vector.load %arg9[%c0_18, %c0_19, %c0_20] : memref<1x16x256xf32, #tpu.memory_space<vmem>>, vector<1x16x256xf32>
    %25 = vector.shape_cast %24 : vector<1x16x256xf32> to vector<16x256xf32>
    %26 = vector.shape_cast %23 : vector<16x256xf32> to vector<1x16x256xf32>
    tpu.vector_store %arg9[%c0_18, %c0_19, %c0_20], %26 {strides = array<i32>} : memref<1x16x256xf32, #tpu.memory_space<vmem>>, vector<1x16x256xf32>,
    return
  }
  func.func @transform_0(%arg0: i32, %arg1: i32) -> (i32, i32, i32) {
    %c0_i32 = arith.constant 0 : i32
    %c0_i32_0 = arith.constant 0 : i32
    return %arg0, %c0_i32, %arg1 : i32, i32, i32
  }
  func.func @transform_1(%arg0: i32, %arg1: i32) -> (i32, i32, i32) {
    %c0_i32 = arith.constant 0 : i32
    %c0_i32_0 = arith.constant 0 : i32
    return %arg0, %c0_i32, %arg1 : i32, i32, i32
  }
  func.func @transform_2(%arg0: i32, %arg1: i32) -> (i32, i32, i32) {
    %c0_i32 = arith.constant 0 : i32
    %c0_i32_0 = arith.constant 0 : i32
    %c0_i32_1 = arith.constant 0 : i32
    return %arg0, %c0_i32, %c0_i32_0 : i32, i32, i32
  }
  func.func @transform_3(%arg0: i32, %arg1: i32) -> (i32, i32) {
    %c0_i32 = arith.constant 0 : i32
    %c0_i32_0 = arith.constant 0 : i32
    %c0_i32_1 = arith.constant 0 : i32
    return %c0_i32, %c0_i32_0 : i32, i32
  }
  func.func @transform_4(%arg0: i32, %arg1: i32) -> (i32, i32) {
    %c0_i32 = arith.constant 0 : i32
    %c0_i32_0 = arith.constant 0 : i32
    %c0_i32_1 = arith.constant 0 : i32
    return %c0_i32, %c0_i32_0 : i32, i32
  }
  func.func @transform_5(%arg0: i32, %arg1: i32) -> (i32, i32) {
    %c0_i32 = arith.constant 0 : i32
    %c0_i32_0 = arith.constant 0 : i32
    %c0_i32_1 = arith.constant 0 : i32
    return %c0_i32, %c0_i32_0 : i32, i32
  }
  func.func @transform_6(%arg0: i32, %arg1: i32) -> (i32, i32, i32) {
    %c0_i32 = arith.constant 0 : i32
    %c0_i32_0 = arith.constant 0 : i32
    return %arg0, %c0_i32, %arg1 : i32, i32, i32
  }
  func.func @transform_7(%arg0: i32, %arg1: i32) -> (i32, i32, i32) {
    %c0_i32 = arith.constant 0 : i32
    %c0_i32_0 = arith.constant 0 : i32
    return %arg0, %c0_i32, %arg1 : i32, i32, i32
  }
}

</mosaic_0001>

<bundles_post_ra>
// kernel: tpu_custom_call.1
= control target key start
LH: loop header
LB: loop body
LE: loop exit
PB: predicated region body
PF: predicated region fallthrough
CT: control target
= control target key end

     0   :  { %s3307_s0 = inlined_call_operand.vmem [shape: s32[2,8,512], index: 0, kind: input, shape index: {}]   ;;  %s3308_s1 = inlined_call_operand.hbm [shape: f32[2,8,512], index: 1, kind: input, shape index: {}]   ;;  %s3309_s2 = inlined_call_operand.hbm [shape: bf16[2,24,512], index: 2, kind: input, shape index: {}]   ;;  %s3310_s3 = inlined_call_operand.vmem [shape: f32[32,8], index: 3, kind: input, shape index: {}]   ;;  %s3311_s4 = inlined_call_operand.vmem [shape: f32[16,8], index: 4, kind: input, shape index: {}]   ;;  %s3312_s5 = inlined_call_operand.vmem [shape: f32[16,1], index: 5, kind: input, shape index: {}]   ;;  %s3313_s6 = inlined_call_operand.hbm [shape: f32[2,16,512], index: 6, kind: output, shape index: {0}]   ;;  %s3314_s7 = inlined_call_operand.hbm [shape: f32[2,16,512], index: 7, kind: output, shape index: {1}]  }
   0x1   :  { %3373 = sst [smem:[#allocation60_spill]] %s3307_s0 }
   0x2   :  { %3374 = sst [smem:[#allocation61_spill]] %s3313_s6 }
   0x3   :  { %3375 = sst [smem:[#allocation62_spill]] %s3314_s7 }
   0x4   :  { %13 = vsyncpa [#allocation3], 0 }
   0x5   :  { %15 = vsyncpa [#allocation3 + $0x1], 0 }
   0x6   :  { %16 = vsyncpa [#allocation6], 0 }
   0x7   :  { %18 = vsyncpa [#allocation6 + $0x1], 0 }
   0x8   :  { %19 = vsyncpa [#allocation4], 0 }
   0x9   :  { %21 = vsyncpa [#allocation4 + $0x1], 0 }
   0xa   :  { %22 = vsyncpa [#allocation9], 0 }
   0xb   :  { %24 = vsyncpa [#allocation9 + $0x1], 0  ;;  %s2292_s24 = smov 0   ;;  %s2294_s25 = smov 0  }
   0xc   :  { %s2296_s26 = smov 0   ;;  %s2298_s27 = smov 0  }
   0xd   :  { %s2300_s28 = smov 0   ;;  %s2302_s29 = smov 0  }
   0xe   :  { %s2304_s30 = smov 0   ;;  %s2306_s8 = smov 0  }
   0xf   :  { %s2308_s9 = smov 0   ;;  %s2310_s10 = smov 0  }
  0x10   :  { %s2312_s11 = smov 0  }
  0x11 LB: > { %3376 = sst [smem:[#allocation14_spill]] %s2198_s27  ;;  %s1537_s12 = sadd.s32 4294967295, %s2226_s11   ;;  %s2226_s11 = sphi %s2312_s11, %s30_s11   ;;  %s2222_s10 = sphi %s2310_s10, %s3500_s10   ;;  %s2218_s9 = sphi %s2308_s9, %s3499_s9   ;;  %s2214_s8 = sphi %s2306_s8, %s3498_s8   ;;  %s2210_s30 = sphi %s2304_s30, %s3497_s30   ;;  %s2206_s29 = sphi %s2302_s29, %s3489_s29   ;;  %s2202_s28 = sphi %s2300_s28, %s3496_s28   ;;  %s2198_s27 = sphi %s2298_s27, %s3495_s27   ;;  %s2194_s26 = sphi %s2296_s26, %s3494_s26   ;;  %s2190_s25 = sphi %s2294_s25, %s3493_s25   ;;  %s2186_s24 = sphi %s2292_s24, %s3492_s24  }
  0x12   : > { %3377 = sst [smem:[#allocation15_spill]] %s2206_s29  ;;  %s1538_s13 = sadd.s32 4294967294, %s2226_s11  }
  0x13   : > { %s39_s14 = sadd.s32 1, %s2218_s9  ;;  %s42_s15 = sadd.s32 1, %s2222_s10 }
  0x14   : > { %p40_p0 = scmp.ge.s32.totalorder %s39_s14, 2  ;;  %s79_s16 = sadd.s32 1, %s2206_s29 }
  0x15   : > { %p86_p1 = scmp.ne.s32.totalorder %s2206_s29, %s2202_s28  ;;  %p87_p2 = scmp.eq.s32.totalorder %s2226_s11, 0 }
  0x16   : > { %s3502_s14 = smov (%p40_p0, %s39_s14), 0  ;;  %s3504_s15 = smov (!%p40_p0, %s42_s15), %s2222_s10 }
  0x17   : > { %3378 = sst [smem:[#allocation16_spill]] %s3502_s14  ;;  %s75_s17 = ssub.s32 %s2218_s9, %s3502_s14 }
  0x18   : > { %p2365_p3 = por %p87_p2, %p86_p1  ;;  %p44_p4 = scmp.ge.s32.totalorder %s3504_s15, 2 }
  0x19   : > { %p92_p5 = scmp.ne.s32.totalorder %s2202_s28, %s2198_s27  ;;  %p2371_p6 = scmp.eq.s32.totalorder %s1537_s12, 0 }
  0x1a   : > { %s105_s20 = sadd.s32 1, %s2194_s26  ;;  %s3506_s15 = smov (%p44_p4, %s3504_s15), 0 }
  0x1b   : > { %3381 = sst [smem:[#allocation17_spill]] %s3506_s15  ;;  %p2383_p7 = por %p2371_p6, %p92_p5 }
  0x1c   : > { %p112_p8 = scmp.ne.s32.totalorder %s2194_s26, %s2190_s25  ;;  %s74_s22 = ssub.s32 %s2222_s10, %s3506_s15 }
  0x1d   : > { %s3382_s21 = scalar_select %p2383_p7, 1, 0 }
  0x1e   : > { %p118_p9 = scmp.ne.s32.totalorder %s2190_s25, %s2186_s24  ;;  %s76_s23 = sor.u32 %s75_s17, %s74_s22 }
  0x1f   : > { %p103_p10 = scmp.eq.s32.totalorder %s74_s22, 0  ;;  %p77_p11 = scmp.eq.s32.totalorder %s76_s23, 0 }
  0x20   : > { %p2395_p12 = por %p112_p8, %p87_p2  ;;  %p2407_p13 = por %p118_p9, %p2371_p6 }
  0x21   : > { %s2400_s6 = scalar_select %p103_p10, %s2194_s26, %s105_s20  }
  0x22   : > { %s2403_s7 = scalar_select %p77_p11, %s2206_s29, %s79_s16  }
  0x23   : > { %3384 = sst [smem:[#allocation18_spill]] %s2400_s6  ;;  %p207_p0 = scmp.eq.s32.totalorder %s1537_s12, 3 }
  0x24   : > { %3385 = sst [smem:[#allocation19_spill]] %s2403_s7  ;;  %p213_p4 = scmp.eq.s32.totalorder %s1538_s13, 3 }
  0x25   : > { %s3386_s15 = scalar_select %p2407_p13, 1, 0 }
  0x26   : > { %p2414_p2 = por %p207_p0, %p86_p1  ;;  %p1873_p8 = scmp.lt.s32.totalorder %s2226_s11, 4 }
  0x27   : > { %p2422_p10 = por %p213_p4, %p92_p5  ;;  %s283_s17 = sand.u32 1, %s2206_s29  }
  0x28   : > { %s3387_s24 = scalar_select %p2414_p2, 1, 0 }
  0x29   : > { %s3389_s16 = scalar_select %p2422_p10, 1, 0 }
  0x2a   : > { %3388 = sst [smem:[#allocation20_spill]] %s3387_s24  ;;  %s1541_s19 = sshll.u32 %s283_s17, 4 }
  0x2b   : > { %s1542_s20 = sshll.u32 %s2218_s9, 1  ;;  %s1543_s22 = sshll.u32 %s2222_s10, 2 }
  0x2c   : > { %s287_s12 = scalar_lea.vmem [#allocation2], %s1541_s19  ;;  %s293_s7 = sadd.s32 %s1543_s22, %s1542_s20 }
  0x2d   : > { %s297_s23 = sshll.u32 %s287_s12, 4  ;;  %s1544_s13 = sshll.u32 %s293_s7, 7  ;;  %s2429_s23 = int_to_ptr.vmem [resolvable:$true] %s297_s23 }
  0x2e   : > { %p2435_p1 = pnand %p1873_p8, %p2365_p3  ;;  %s2442_s29 = scalar_lea.hbm %s3308_s1, %s1544_s13 }
  0x2f   : > { %p2448_p5 = pnand %p1873_p8, %p2395_p12  ;;  %s284_s18 = scalar_lea.sflag [#allocation3], %s283_s17 }
  0x30   : > { %s1996_s19 = scalar_lea.hbm %s2442_s29, 256  ;;  %p1998_p9 = pneg %p2435_p1 }
  0x31   : > { %p1997_p6 = scmp.ne.s32.totalorder %s2442_s29, %s1996_s19  ;;  %s2001_s24 = scalar_lea.hbm %s3308_s1, 1024 }
  0x32   : > { %p2002_p12 = scmp.lt.u32.totalorder %s2442_s29, %s3308_s1  ;;  %p2003_p4 = scmp.lt.u32.totalorder %s2001_s24, %s1996_s19 }
  0x33   : > { %p1999_p11 = pnand %p1998_p9, %p1997_p6  ;;  %p2005_p3 = scmp.lt.u32.totalorder %s1996_s19, %s2442_s29 }
  0x34   : > { %p2004_p8 = por %p2003_p4, %p2002_p12 }
  0x35   : > { %p2000_p0 = pneg %p1999_p11 }
  0x36   : > { %p2006_p10 = por %p2005_p3, %p2004_p8 }
  0x38   : > { %p2007_p2 = pnand %p2006_p10, %p2000_p0 }
  0x3a   : > { %2010 = shalt.err (!%p2007_p2)
}
  0x3b   : > { %s2011_s17 = scalar_lea.vmem %s2429_s23, 256  ;;  %s2240_s12 = smov [#allocation2]  }
  0x3c   : > { %p2012_p6 = scmp.ne.s32.totalorder %s2429_s23, %s2011_s17  ;;  %s2016_s13 = sshll.u32 %s2240_s12, 4  ;;  %s2017_s13 = int_to_ptr.vmem [resolvable:$false] %s2016_s13 }
  0x3d   : > { %s2018_s27 = scalar_lea.vmem %s2017_s13, 512  ;;  %p2019_p7 = scmp.lt.s32.totalorder %s2429_s23, %s2017_s13 }
  0x3e   : > { %p2014_p11 = pnand %p2012_p6, %p1998_p9  ;;  %p2020_p12 = scmp.lt.s32.totalorder %s2018_s27, %s2011_s17 }
  0x40   : > { %p2015_p13 = pneg %p2014_p11  ;;  %p2021_p4 = por %p2020_p12, %p2019_p7 }
  0x42   : > { %p2022_p3 = pnand %p2021_p4, %p2015_p13 }
  0x44   : > { %2025 = shalt.err (!%p2022_p3)
}
  0x45   : > { %1862 = dma.hbm_to_vmem [thread:$0]  (!%p2435_p1), %s2442_s29, 256, %s2429_s23, %s284_s18  }
  0x46   : > { %p323_p2 = scmp.lt.s32.totalorder %s2226_s11, 5  ;;  %s304_s19 = sand.u32 1, %s2194_s26  }
  0x47   : > { %s1849_s14 = smul.u32 768, %s2222_s10  ;;  %p3392_p10 = scmp.ge.s32.totalorder %s2226_s11, 1 }
  0x48   : > { %s1848_s20 = smul.u32 48, %s304_s19  ;;  %s2494_s23 = scalar_lea.sflag [#allocation6], %s304_s19 }
  0x49   : > { %p2483_p9 = pnand %p3392_p10, %p323_p2  ;;  %s2490_s17 = scalar_lea.hbm %s3309_s2, %s1849_s14 }
  0x4a   : > { %s308_s12 = scalar_lea.vmem [#allocation5], %s1848_s20  ;;  %s2026_s18 = scalar_lea.hbm %s2490_s17, 768 }
  0x4b   : > { %s315_s29 = sshll.u32 %s308_s12, 4  ;;  %p2027_p7 = scmp.ne.s32.totalorder %s2490_s17, %s2026_s18  ;;  %s2492_s29 = int_to_ptr.vmem [resolvable:$true] %s315_s29 }
  0x4c   : > { %p2028_p13 = pneg %p2448_p5  ;;  %s2031_s14 = scalar_lea.hbm %s3309_s2, 1536 }
  0x4d   : > { %p2032_p8 = scmp.lt.u32.totalorder %s2490_s17, %s3309_s2  ;;  %p2033_p6 = scmp.lt.u32.totalorder %s2031_s14, %s2026_s18 }
  0x4e   : > { %p2029_p1 = pnand %p2028_p13, %p2027_p7  ;;  %p2035_p12 = scmp.lt.u32.totalorder %s2026_s18, %s2490_s17 }
  0x4f   : > { %p2034_p11 = por %p2033_p6, %p2032_p8 }
  0x50   : > { %p2030_p0 = pneg %p2029_p1 }
  0x51   : > { %p2036_p4 = por %p2035_p12, %p2034_p11 }
  0x53   : > { %p2037_p3 = pnand %p2036_p4, %p2030_p0 }
  0x55   : > { %2040 = shalt.err (!%p2037_p3)
}
  0x56   : > { %s2041_s19 = scalar_lea.vmem %s2492_s29, 768  ;;  %s2241_s20 = smov [#allocation5]  }
  0x57   : > { %p2042_p2 = scmp.ne.s32.totalorder %s2492_s29, %s2041_s19  ;;  %s2046_s12 = sshll.u32 %s2241_s20, 4  ;;  %s2047_s12 = int_to_ptr.vmem [resolvable:$false] %s2046_s12 }
  0x58   : > { %s2048_s13 = scalar_lea.vmem %s2047_s12, 1536  ;;  %p2049_p1 = scmp.lt.s32.totalorder %s2492_s29, %s2047_s12 }
  0x59   : > { %p2044_p10 = pnand %p2042_p2, %p2028_p13  ;;  %p2050_p8 = scmp.lt.s32.totalorder %s2048_s13, %s2041_s19 }
  0x5b   : > { %p2045_p7 = pneg %p2044_p10  ;;  %p2051_p6 = por %p2050_p8, %p2049_p1 }
  0x5d   : > { %p2052_p11 = pnand %p2051_p6, %p2045_p7 }
  0x5f   : > { %2055 = shalt.err (!%p2052_p11)
}
  0x60   : > { %s2242_s18 = smov 256   ;;  %s2243_s27 = smov 16  }
  0x61   : > { %1865 = dma.hbm_to_vmem [thread:$0]  (!%p2448_p5), %s2490_s17, 768, %s2492_s29, %s2494_s23, %s2242_s18, %s2242_s18, %s2243_s27  }
  0x62   : > { %327 = sbr.rel (%p2483_p9) target bundleno = 707 (0x2c3), region = 44 }
  0x69   : > { %s2525_s14 = sand.u32 1, %s2202_s28   ;;  %p3394_p13 = scmp.ne.s32.totalorder %s3382_s21, 0 }
  0x6a   : > { %s1547_s22 = sshll.u32 %s2525_s14, 4  ;;  %s330_s6 = scalar_lea.sflag [#allocation3], %s2525_s14 }
  0x6b   : > { %s2529_s19 = scalar_lea.vmem [#allocation2], %s1547_s22 }
  0x6c   : > { %2169 = dma.done.wait (%p3394_p13), %s330_s6, 256  }
  0x6d   : > { %2171 = vsyncadd (%p3394_p13), %s330_s6, 4294967040  ;;  %s338_s7 = sand.u32 1, %s2190_s25   ;;  %p3395_p5 = scmp.ne.s32.totalorder %s3386_s15, 0 }
  0x6e   : > { %s1850_s24 = smul.u32 48, %s338_s7  ;;  %s339_s17 = scalar_lea.sflag [#allocation6], %s338_s7 }
  0x70   : > { %s2536_s29 = scalar_lea.vmem [#allocation5], %s1850_s24 }
  0x71   : > { %2173 = dma.done.wait (%p3395_p5), %s339_s17, 768  }
  0x72   : > { %2175 = vsyncadd (%p3395_p5), %s339_s17, 4294966528  ;;  %s1548_s23 = sshll.u32 %s2525_s14, 5  ;;  %s2544_s20 = sshll.u32 %s2210_s30, 1  ;;  %v413_v0 = vlaneseq  ;;  %v2589_v14 = vld [vmem:[%s2529_s19] sm:$0xff]  ;;  %v2592_v15 = vld [vmem:[%s2529_s19 + $0x8] sm:$0xff] }
  0x73   : > { %p393_p9 = scmp.lt.s32.totalorder %s2214_s8, 1  ;;  %p395_p0 = scmp.lt.s32.totalorder %s2544_s20, 3  ;;  %3409 = vst [vmem:[#allocation34_spill] sm:$0xff] %v2589_v14  ;;  %3410 = vst [vmem:[#allocation35_spill] sm:$0xff] %v2592_v15  ;;  %v2595_v16 = vld [vmem:[%s2536_s29] sm:$0xff]  ;;  %v2607_v20 = vld [vmem:[%s2536_s29 + $0x8] sm:$0xff] }
  0x74   : > { %v2548_v1 = vshrl.u32 %v413_v0, 7  ;;  %3411 = vst [vmem:[#allocation36_spill] sm:$0xff] %v2595_v16  ;;  %3415 = vst [vmem:[#allocation40_spill] sm:$0xff] %v2607_v20  ;;  %v2610_v21 = vld [vmem:[%s2536_s29 + $0x10] sm:$0xff]  ;;  %v2613_v22 = vld [vmem:[%s2536_s29 + $0x18] sm:$0xff]  ;;  %s3417_s0 = sld [smem:[#allocation60_spill]] }
  0x75   : > { %s394_s21 = scalar_select %p393_p9, %s2214_s8, 1  ;;  %3416 = vst [vmem:[#allocation41_spill] sm:$0xff] %v2610_v21  ;;  %v2627_v25 = vld [vmem:[%s2536_s29 + $0x20] sm:$0xff]  ;;  %v2630_v26 = vld [vmem:[%s2536_s29 + $0x28] sm:$0xff] }
  0x76   : > { %3396 = vst [vmem:[#allocation21_spill] sm:$0xff] %v2548_v1  ;;  %v2552_v2 = vadd.s32 8, %v2548_v1  ;;  %v2555_v3 = vadd.s32 16, %v2548_v1  ;;  %v2558_v4 = vadd.s32 24, %v2548_v1  ;;  %v2561_v5 = vadd.s32 32, %v2548_v1  ;;  %s396_s30 = scalar_select %p395_p0, %s2544_s20, 3 }
  0x77   : > { %v2565_v6 = vadd.s32 40, %v2548_v1  ;;  %v2568_v7 = vadd.s32 48, %v2548_v1  ;;  %v2571_v8 = vadd.s32 56, %v2548_v1  ;;  %v2574_v9 = vadd.s32 64, %v2548_v1  ;;  %s1551_s15 = sshll.u32 %s394_s21, 2  ;;  %3418 = vst [vmem:[#allocation42_spill] sm:$0xff] %v2627_v25 }
  0x78   : > { %3397 = vst [vmem:[#allocation22_spill] sm:$0xff] %v2552_v2  ;;  %3398 = vst [vmem:[#allocation23_spill] sm:$0xff] %v2555_v3  ;;  %v2577_v10 = vadd.s32 72, %v2548_v1  ;;  %v2580_v11 = vadd.s32 80, %v2548_v1  ;;  %v2583_v12 = vadd.s32 88, %v2548_v1  ;;  %v2586_v13 = vadd.s32 96, %v2548_v1  ;;  %s398_s12 = sadd.s32 %s1551_s15, %s396_s30 }
  0x79   : > { %3399 = vst [vmem:[#allocation24_spill] sm:$0xff] %v2558_v4  ;;  %3400 = vst [vmem:[#allocation25_spill] sm:$0xff] %v2561_v5  ;;  %v2598_v17 = vadd.s32 104, %v2548_v1  ;;  %v2601_v18 = vadd.s32 112, %v2548_v1  ;;  %v2604_v19 = vadd.s32 120, %v2548_v1  ;;  %s1552_s13 = sshll.u32 %s398_s12, 3 }
  0x7a   : > { %3401 = vst [vmem:[#allocation26_spill] sm:$0xff] %v2565_v6  ;;  %3402 = vst [vmem:[#allocation27_spill] sm:$0xff] %v2568_v7  ;;  %v2616_v23 = vadd.s32 128, %v2548_v1  ;;  %v2619_v24 = vadd.s32 136, %v2548_v1  ;;  %s2624_s22 = scalar_lea.vmem %s3417_s0, %s1552_s13  ;;  %v2633_v27 = vadd.s32 144, %v2548_v1  ;;  %v2636_v28 = vadd.s32 152, %v2548_v1 }
  0x7b   : > { %3403 = vst [vmem:[#allocation28_spill] sm:$0xff] %v2571_v8  ;;  %3404 = vst [vmem:[#allocation29_spill] sm:$0xff] %v2574_v9  ;;  %v2639_v29 = vadd.s32 160, %v2548_v1  ;;  %v2642_v30 = vadd.s32 168, %v2548_v1  ;;  %v2645_v31 = vadd.s32 176, %v2548_v1  ;;  %v2648_v32 = vadd.s32 184, %v2548_v1 }
  0x7c   : > { %3405 = vst [vmem:[#allocation30_spill] sm:$0xff] %v2577_v10  ;;  %3406 = vst [vmem:[#allocation31_spill] sm:$0xff] %v2580_v11  ;;  %v2651_v33 = vadd.s32 192, %v2548_v1  ;;  %v2654_v34 = vadd.s32 200, %v2548_v1  ;;  %v2657_v35 = vadd.s32 208, %v2548_v1  ;;  %v2660_v36 = vadd.s32 216, %v2548_v1 }
  0x7d   : > { %3407 = vst [vmem:[#allocation32_spill] sm:$0xff] %v2583_v12  ;;  %3408 = vst [vmem:[#allocation33_spill] sm:$0xff] %v2586_v13  ;;  %v2663_v37 = vadd.s32 224, %v2548_v1  ;;  %v2666_v38 = vadd.s32 232, %v2548_v1  ;;  %v2669_v39 = vadd.s32 240, %v2548_v1  ;;  %v2672_v40 = vadd.s32 248, %v2548_v1 }
  0x7e   : > { %3412 = vst [vmem:[#allocation37_spill] sm:$0xff] %v2598_v17  ;;  %3413 = vst [vmem:[#allocation38_spill] sm:$0xff] %v2601_v18  ;;  %v2675_v41 = vadd.s32 256, %v2548_v1  ;;  %v2678_v42 = vadd.s32 264, %v2548_v1  ;;  %v2681_v43 = vadd.s32 272, %v2548_v1  ;;  %v2684_v44 = vadd.s32 280, %v2548_v1 }
  0x7f   : > { %3414 = vst [vmem:[#allocation39_spill] sm:$0xff] %v2604_v19  ;;  %3419 = vst [vmem:[#allocation43_spill] sm:$0xff] %v2630_v26  ;;  %v2687_v45 = vadd.s32 288, %v2548_v1  ;;  %v2690_v46 = vadd.s32 296, %v2548_v1  ;;  %v2693_v47 = vadd.s32 304, %v2548_v1  ;;  %v2696_v48 = vadd.s32 312, %v2548_v1 }
  0x80   : > { %3420 = vst [vmem:[#allocation44_spill] sm:$0xff] %v2660_v36  ;;  %3421 = vst [vmem:[#allocation45_spill] sm:$0xff] %v2663_v37  ;;  %v2699_v49 = vadd.s32 320, %v2548_v1  ;;  %v2702_v50 = vadd.s32 328, %v2548_v1  ;;  %v2705_v51 = vadd.s32 336, %v2548_v1  ;;  %v2708_v52 = vadd.s32 344, %v2548_v1 }
  0x81   : > { %3422 = vst [vmem:[#allocation46_spill] sm:$0xff] %v2666_v38  ;;  %3423 = vst [vmem:[#allocation47_spill] sm:$0xff] %v2669_v39  ;;  %v2711_v53 = vadd.s32 352, %v2548_v1  ;;  %v2714_v54 = vadd.s32 360, %v2548_v1  ;;  %v2717_v55 = vadd.s32 368, %v2548_v1  ;;  %v2720_v56 = vadd.s32 376, %v2548_v1 }
  0x82   : > { %3424 = vst [vmem:[#allocation48_spill] sm:$0xff] %v2672_v40  ;;  %v2723_v57 = vadd.s32 384, %v2548_v1  ;;  %v2726_v58 = vadd.s32 392, %v2548_v1  ;;  %v2729_v59 = vadd.s32 400, %v2548_v1  ;;  %v2732_v60 = vadd.s32 408, %v2548_v1  ;;  %s2772_s6 = scalar_lea.vmem [#allocation7], %s1548_s23 }
  0x83   : > { %v2735_v61 = vadd.s32 416, %v2548_v1  ;;  %v2738_v62 = vadd.s32 424, %v2548_v1  ;;  %v2741_v63 = vadd.s32 432, %v2548_v1  ;;  %v2744_v0 = vadd.s32 440, %v2548_v1  ;;  %s2776_s19 = scalar_lea.vmem [#allocation8], %s1548_s23  ;;  %s2782_s7 = smov 0  }
  0x84   : > { %v2747_v14 = vadd.s32 448, %v2548_v1  ;;  %v2750_v15 = vadd.s32 456, %v2548_v1  ;;  %v2753_v26 = vadd.s32 464, %v2548_v1  ;;  %v2756_v25 = vadd.s32 472, %v2548_v1 }
  0x85   : > { %3425 = vst [vmem:[#allocation49_spill] sm:$0xff] %v2744_v0  ;;  %v2759_v40 = vadd.s32 480, %v2548_v1  ;;  %v2762_v39 = vadd.s32 488, %v2548_v1  ;;  %v2765_v38 = vadd.s32 496, %v2548_v1  ;;  %v2768_v37 = vadd.s32 504, %v2548_v1 }
  0x86   : > { %3426 = vst [vmem:[#allocation50_spill] sm:$0xff] %v2747_v14  ;;  %3427 = vst [vmem:[#allocation51_spill] sm:$0xff] %v2750_v15 }
  0x87   : > { %3428 = vst [vmem:[#allocation52_spill] sm:$0xff] %v2753_v26  ;;  %3429 = vst [vmem:[#allocation53_spill] sm:$0xff] %v2756_v25  ;;  %v2778_v26 = vmov -inf   ;;  %v2780_v25 = vmov -inf  }
  0x88   : > { %3430 = vst [vmem:[#allocation54_spill] sm:$0xff] %v2759_v40  ;;  %3431 = vst [vmem:[#allocation55_spill] sm:$0xff] %v2762_v39 }
  0x89   : > { %3432 = vst [vmem:[#allocation56_spill] sm:$0xff] %v2765_v38  ;;  %3433 = vst [vmem:[#allocation57_spill] sm:$0xff] %v2768_v37 }
  0x8a LB: >> { %v3434_v21 = vld [vmem:[#allocation41_spill] sm:$0xff]  ;;  %v3435_v20 = vld [vmem:[#allocation40_spill] sm:$0xff]  ;;  %v3436_v19 = vld [vmem:[#allocation39_spill] sm:$0xff]  ;;  %3456 = vst [vmem:[#allocation58_spill] sm:$0xff] %v2230_v26  ;;  %s486_s24 = sshra.s32 %s2238_s7, 3  ;;  %s489_s17 = sand.u32 7, %s2238_s7  ;;  %v2230_v26 = vphi %v2778_v26, %v3476_v26   ;;  %s2238_s7 = sphi %s2782_s7, %s483_s7   ;;  %v2234_v25 = vphi %v2780_v25, %v3477_v25  }
  0x8b   : >> { %v3437_v18 = vld [vmem:[#allocation38_spill] sm:$0xff]  ;;  %v3438_v17 = vld [vmem:[#allocation37_spill] sm:$0xff]  ;;  %v3439_v16 = vld [vmem:[#allocation36_spill] sm:$0xff]  ;;  %3457 = vst [vmem:[#allocation59_spill] sm:$0xff] %v2234_v25  ;;  %v1686_v38 = vcombine.high %v3435_v20, %v2613_v22  ;;  %s1835_s29 = sshll.u32 %s486_s24, 4  ;;  %s483_s7 = sadd.s32 1, %s2238_s7  }
  0x8c   : >> { %v3442_v13 = vld [vmem:[#allocation33_spill] sm:$0xff]  ;;  %v3443_v12 = vld [vmem:[#allocation32_spill] sm:$0xff]  ;;  %v3444_v11 = vld [vmem:[#allocation31_spill] sm:$0xff]  ;;  %v1684_v37 = vcombine.high %v3439_v16, %v3434_v21  ;;  %s492_s23 = sadd.s32 %s1835_s29, %s489_s17  ;;  %p480_p12 = scmp.ge.s32.totalorder %s483_s7, 8  }
  0x8d   : >> { %v3440_v15 = vld [vmem:[#allocation51_spill] sm:$0xff]  ;;  %v3441_v14 = vld [vmem:[#allocation50_spill] sm:$0xff]  ;;  %v3446_v9 = vld [vmem:[#allocation29_spill] sm:$0xff]  ;;  %1068 = vmatprep.mubr.bf16.mxu0 %v1686_v38  ;;  %s493_s21 = scalar_lea.vmem %s2624_s22, %s492_s23  ;;  %s1828_s13 = sshll.u32 (%p480_p12), %s2214_s8, 3 }
  0x8e   : >> { %v3445_v10 = vld [vmem:[#allocation30_spill] sm:$0xff]  ;;  %v3447_v8 = vld [vmem:[#allocation28_spill] sm:$0xff]  ;;  %v3448_v7 = vld [vmem:[#allocation27_spill] sm:$0xff]  ;;  %1017 = vmatprep.mubr.bf16.mxu1 %v1684_v37  ;;  %s3185_s18 = sadd.s32 (%p480_p12), %s1828_s13, %s2544_s20  ;;  %s1357_s22 = sshll.u32 (%p480_p12), %s2776_s19, 4  ;;  %s3198_s22 = int_to_ptr.vmem [resolvable:$true] %s1357_s22 }
  0x8f   : >> { %v3449_v6 = vld [vmem:[#allocation26_spill] sm:$0xff]  ;;  %v3450_v5 = vld [vmem:[#allocation25_spill] sm:$0xff]  ;;  %v3451_v4 = vld [vmem:[#allocation24_spill] sm:$0xff]  ;;  %s1829_s27 = sshll.u32 (%p480_p12), %s3185_s18, 7  ;;  %s3480_s7 = sld [smem:[#allocation62_spill]] (%p480_p12) }
  0x90   : >> { %v3452_v3 = vld [vmem:[#allocation23_spill] sm:$0xff]  ;;  %v3453_v2 = vld [vmem:[#allocation22_spill] sm:$0xff]  ;;  %v3454_v1 = vld [vmem:[#allocation21_spill] sm:$0xff]  ;;  %s3481_s17 = sld [smem:[#allocation20_spill]] (%p480_p12)  ;;  %s1324_s29 = scalar_lea.sflag (%p480_p12), [#allocation9], %s2525_s14 }
  0x91   : >> { %v3455_v0 = vld [vmem:[#allocation49_spill] sm:$0xff]  ;;  %v501_v39 = vsub.s32 1, %v3454_v1  ;;  %v497_v26 = vsub.s32 0, %v3454_v1  ;;  %v3460_v38 = vld [vmem:[#allocation52_spill] sm:$0xff]  ;;  %s2056_s23 = scalar_lea.vmem (%p480_p12), %s3198_s22, 512 }
  0x92   : >> { %v494_v25 = vld [vmem:[%s493_s21] ss:$8 sm:$0x3]  ;;  %p2057_p4 = scmp.ne.s32.totalorder (%p480_p12), %s3198_s22, %s2056_s23  ;;  %s2247_s21 = smov (%p480_p12), [#allocation8]  }
  0x93   : >> { %v2802_v40 = vrot.slane %v494_v25, %v501_v39  ;;  %v2804_v36 = vrot.slane %v494_v25, %v497_v26  ;;  %v2244_v25 = vmov 1.0|1.0   ;;  %v3458_v26 = vld [vmem:[#allocation44_spill] sm:$0xff]  ;;  %v3461_v39 = vld [vmem:[#allocation53_spill] sm:$0xff]  ;;  %s2060_s30 = sshll.u32 (%p480_p12), %s2247_s21, 4  ;;  %s2061_s30 = int_to_ptr.vmem [resolvable:$false] %s2060_s30 }
  0x94   : >> { %v3459_v37 = vmov %v3458_v26  ;;  %s2062_s15 = scalar_lea.vmem (%p480_p12), %s2061_s30, 1024  ;;  %p2063_p7 = scmp.lt.s32.totalorder (%p480_p12), %s3198_s22, %s2061_s30 }
  0x95   : >> { %vm504_vm0 = vcmp.eq.s32.totalorder %v3454_v1, %v2802_v40  ;;  %vm506_vm1 = vcmp.eq.s32.totalorder %v3453_v2, %v2802_v40  ;;  %vm568_vm2 = vcmp.eq.s32.totalorder %v2675_v41, %v2802_v40  ;;  %vm570_vm3 = vcmp.eq.s32.totalorder %v2678_v42, %v2802_v40  ;;  %s3196_s24 = scalar_lea.hbm (%p480_p12), %s3480_s7, %s1829_s27  ;;  %p2064_p1 = scmp.lt.s32.totalorder (%p480_p12), %s2062_s15, %s2056_s23 }
  0x96   : >> { %vm1691_vm4 = vmpackc.low %vm506_vm1, %vm504_vm0  ;;  %vm503_vm5 = vcmp.eq.s32.totalorder %v3454_v1, %v2804_v36  ;;  %vm505_vm6 = vcmp.eq.s32.totalorder %v3453_v2, %v2804_v36  ;;  %vm567_vm7 = vcmp.eq.s32.totalorder %v2675_v41, %v2804_v36  ;;  %vm569_vm8 = vcmp.eq.s32.totalorder %v2678_v42, %v2804_v36  ;;  %v3464_v1 = vld [vmem:[#allocation46_spill] sm:$0xff]  ;;  %p3482_p3 = scmp.ne.s32.totalorder (%p480_p12), %s3481_s17, 0 }
  0x97   : >> { %1692 = vmatprep.subr.msk.bf16.mxu1 %vm1691_vm4, %v2244_v25  ;;  %vm1755_vm9 = vmpackc.low %vm570_vm3, %vm568_vm2  ;;  %vm508_vm10 = vcmp.eq.s32.totalorder %v3452_v3, %v2802_v40  ;;  %vm510_vm11 = vcmp.eq.s32.totalorder %v3451_v4, %v2802_v40  ;;  %vm572_vm13 = vcmp.eq.s32.totalorder %v2681_v43, %v2802_v40  ;;  %vm574_vm14 = vcmp.eq.s32.totalorder %v2684_v44, %v2802_v40  ;;  %v3465_v2 = vld [vmem:[#allocation54_spill] sm:$0xff]  ;;  %p2065_p8 = por (%p480_p12), %p2064_p1, %p2063_p7 }
  0x98   : >> { %1756 = vmatprep.subr.msk.bf16.mxu0 %vm1755_vm9, %v2244_v25  ;;  %vm1693_vm12 = vmpackc.low %vm505_vm6, %vm503_vm5  ;;  %vm507_vm0 = vcmp.eq.s32.totalorder %v3452_v3, %v2804_v36  ;;  %vm509_vm1 = vcmp.eq.s32.totalorder %v3451_v4, %v2804_v36  ;;  %vm571_vm3 = vcmp.eq.s32.totalorder %v2681_v43, %v2804_v36  ;;  %vm573_vm4 = vcmp.eq.s32.totalorder %v2684_v44, %v2804_v36  ;;  %v3466_v3 = vld [vmem:[#allocation55_spill] sm:$0xff]  ;;  %p2058_p2 = pnand (%p480_p12), %p2057_p4, %p3482_p3 }
  0x99   : >> { %1694 = vmatpush1.bf16.msk.msra.mxu1 %vm1693_vm12, %v2244_v25  ;;  %vm1757_vm15 = vmpackc.low %vm569_vm8, %vm567_vm7  ;;  %vm512_vm6 = vcmp.eq.s32.totalorder %v3450_v5, %v2802_v40  ;;  %vm514_vm7 = vcmp.eq.s32.totalorder %v3449_v6, %v2802_v40  ;;  %vm576_vm9 = vcmp.eq.s32.totalorder %v2687_v45, %v2802_v40  ;;  %vm511_vm12 = vcmp.eq.s32.totalorder %v3450_v5, %v2804_v36 }
  0x9a   : >> { %1758 = vmatpush1.bf16.msk.msra.mxu0 %vm1757_vm15, %v2244_v25  ;;  %vm1695_vm2 = vmpackc.low %vm510_vm11, %vm508_vm10  ;;  %vm578_vm10 = vcmp.eq.s32.totalorder %v2690_v46, %v2802_v40  ;;  %vm575_vm15 = vcmp.eq.s32.totalorder %v2687_v45, %v2804_v36  ;;  %p2059_p10 = pneg (%p480_p12), %p2058_p2 }
  0x9b   : >> { %1696 = vmatprep.subr.msk.bf16.mxu1 %vm1695_vm2, %v2244_v25  ;;  %vm1759_vm5 = vmpackc.low %vm574_vm14, %vm572_vm13  ;;  %vm513_vm13 = vcmp.eq.s32.totalorder %v3449_v6, %v2804_v36  ;;  %vm516_vm2 = vcmp.eq.s32.totalorder %v3448_v7, %v2802_v40 }
  0x9c   : >> { %1760 = vmatprep.subr.msk.bf16.mxu0 %vm1759_vm5, %v2244_v25  ;;  %vm1697_vm8 = vmpackc.low %vm509_vm1, %vm507_vm0  ;;  %vm577_vm0 = vcmp.eq.s32.totalorder %v2690_v46, %v2804_v36  ;;  %vm580_vm5 = vcmp.eq.s32.totalorder %v2693_v47, %v2802_v40  ;;  %p2066_p6 = pnand (%p480_p12), %p2065_p8, %p2059_p10 }
  0x9d   : >> { %1698 = vmatpush1.bf16.msk.msra.mxu1 %vm1697_vm8, %v2244_v25  ;;  %vm1761_vm11 = vmpackc.low %vm573_vm4, %vm571_vm3  ;;  %vm518_vm3 = vcmp.eq.s32.totalorder %v3447_v8, %v2802_v40  ;;  %vm515_vm8 = vcmp.eq.s32.totalorder %v3448_v7, %v2804_v36 }
  0x9e   : >> { %1762 = vmatpush1.bf16.msk.msra.mxu0 %vm1761_vm11, %v2244_v25  ;;  %vm1699_vm14 = vmpackc.low %vm514_vm7, %vm512_vm6  ;;  %vm582_vm6 = vcmp.eq.s32.totalorder %v2696_v48, %v2802_v40  ;;  %vm579_vm11 = vcmp.eq.s32.totalorder %v2693_v47, %v2804_v36 }
  0x9f   : >> { %1700 = vmatprep.subr.msk.bf16.mxu1 %vm1699_vm14, %v2244_v25  ;;  %vm1763_vm1 = vmpackc.low %vm578_vm10, %vm576_vm9  ;;  %vm517_vm9 = vcmp.eq.s32.totalorder %v3447_v8, %v2804_v36  ;;  %vm520_vm14 = vcmp.eq.s32.totalorder %v3446_v9, %v2802_v40 }
  0xa0   : >> { %1764 = vmatprep.subr.msk.bf16.mxu0 %vm1763_vm1, %v2244_v25  ;;  %vm1701_vm4 = vmpackc.low %vm513_vm13, %vm511_vm12  ;;  %vm581_vm12 = vcmp.eq.s32.totalorder %v2696_v48, %v2804_v36  ;;  %vm584_vm1 = vcmp.eq.s32.totalorder %v2699_v49, %v2802_v40 }
  0xa1   : >> { %1702 = vmatpush1.bf16.msk.msra.mxu1 %vm1701_vm4, %v2244_v25  ;;  %vm1765_vm7 = vmpackc.low %vm577_vm0, %vm575_vm15  ;;  %vm522_vm15 = vcmp.eq.s32.totalorder %v3445_v10, %v2802_v40  ;;  %vm519_vm4 = vcmp.eq.s32.totalorder %v3446_v9, %v2804_v36 }
  0xa2   : >> { %1766 = vmatpush1.bf16.msk.msra.mxu0 %vm1765_vm7, %v2244_v25  ;;  %vm1703_vm10 = vmpackc.low %vm518_vm3, %vm516_vm2  ;;  %vm586_vm2 = vcmp.eq.s32.totalorder %v2702_v50, %v2802_v40  ;;  %vm583_vm7 = vcmp.eq.s32.totalorder %v2699_v49, %v2804_v36 }
  0xa3   : >> { %1704 = vmatprep.subr.msk.bf16.mxu1 %vm1703_vm10, %v2244_v25  ;;  %vm1767_vm13 = vmpackc.low %vm582_vm6, %vm580_vm5  ;;  %vm521_vm5 = vcmp.eq.s32.totalorder %v3445_v10, %v2804_v36  ;;  %vm524_vm10 = vcmp.eq.s32.totalorder %v3444_v11, %v2802_v40 }
  0xa4   : >> { %1768 = vmatprep.subr.msk.bf16.mxu0 %vm1767_vm13, %v2244_v25  ;;  %vm1705_vm0 = vmpackc.low %vm517_vm9, %vm515_vm8  ;;  %vm585_vm8 = vcmp.eq.s32.totalorder %v2702_v50, %v2804_v36  ;;  %vm588_vm13 = vcmp.eq.s32.totalorder %v2705_v51, %v2802_v40 }
  0xa5   : >> { %1706 = vmatpush1.bf16.msk.msra.mxu1 %vm1705_vm0, %v2244_v25  ;;  %vm1769_vm3 = vmpackc.low %vm581_vm12, %vm579_vm11  ;;  %vm526_vm11 = vcmp.eq.s32.totalorder %v3443_v12, %v2802_v40  ;;  %vm523_vm0 = vcmp.eq.s32.totalorder %v3444_v11, %v2804_v36 }
  0xa6   : >> { %1770 = vmatpush1.bf16.msk.msra.mxu0 %vm1769_vm3, %v2244_v25  ;;  %vm1707_vm6 = vmpackc.low %vm522_vm15, %vm520_vm14  ;;  %vm590_vm14 = vcmp.eq.s32.totalorder %v2708_v52, %v2802_v40  ;;  %vm587_vm3 = vcmp.eq.s32.totalorder %v2705_v51, %v2804_v36 }
  0xa7   : >> { %1708 = vmatprep.subr.msk.bf16.mxu1 %vm1707_vm6, %v2244_v25  ;;  %vm1771_vm9 = vmpackc.low %vm586_vm2, %vm584_vm1  ;;  %vm525_vm1 = vcmp.eq.s32.totalorder %v3443_v12, %v2804_v36  ;;  %vm528_vm6 = vcmp.eq.s32.totalorder %v3442_v13, %v2802_v40 }
  0xa8   : >> { %1772 = vmatprep.subr.msk.bf16.mxu0 %vm1771_vm9, %v2244_v25  ;;  %vm1709_vm12 = vmpackc.low %vm521_vm5, %vm519_vm4  ;;  %vm589_vm4 = vcmp.eq.s32.totalorder %v2708_v52, %v2804_v36  ;;  %vm592_vm9 = vcmp.eq.s32.totalorder %v2711_v53, %v2802_v40 }
  0xa9   : >> { %1710 = vmatpush1.bf16.msk.msra.mxu1 %vm1709_vm12, %v2244_v25  ;;  %vm1773_vm15 = vmpackc.low %vm585_vm8, %vm583_vm7  ;;  %vm530_vm7 = vcmp.eq.s32.totalorder %v3438_v17, %v2802_v40  ;;  %vm527_vm12 = vcmp.eq.s32.totalorder %v3442_v13, %v2804_v36 }
  0xaa   : >> { %1774 = vmatpush1.bf16.msk.msra.mxu0 %vm1773_vm15, %v2244_v25  ;;  %vm1711_vm2 = vmpackc.low %vm526_vm11, %vm524_vm10  ;;  %vm594_vm10 = vcmp.eq.s32.totalorder %v2714_v54, %v2802_v40  ;;  %vm591_vm15 = vcmp.eq.s32.totalorder %v2711_v53, %v2804_v36 }
  0xab   : >> { %1712 = vmatprep.subr.msk.bf16.mxu1 %vm1711_vm2, %v2244_v25  ;;  %vm1775_vm5 = vmpackc.low %vm590_vm14, %vm588_vm13  ;;  %vm529_vm13 = vcmp.eq.s32.totalorder %v3438_v17, %v2804_v36  ;;  %vm532_vm2 = vcmp.eq.s32.totalorder %v3437_v18, %v2802_v40 }
  0xac   : >> { %1776 = vmatprep.subr.msk.bf16.mxu0 %vm1775_vm5, %v2244_v25  ;;  %vm1713_vm8 = vmpackc.low %vm525_vm1, %vm523_vm0  ;;  %vm593_vm0 = vcmp.eq.s32.totalorder %v2714_v54, %v2804_v36  ;;  %vm596_vm5 = vcmp.eq.s32.totalorder %v2717_v55, %v2802_v40 }
  0xad   : >> { %1714 = vmatpush1.bf16.msk.msra.mxu1 %vm1713_vm8, %v2244_v25  ;;  %vm1777_vm11 = vmpackc.low %vm589_vm4, %vm587_vm3  ;;  %vm534_vm3 = vcmp.eq.s32.totalorder %v3436_v19, %v2802_v40  ;;  %vm531_vm8 = vcmp.eq.s32.totalorder %v3437_v18, %v2804_v36 }
  0xae   : >> { %1778 = vmatpush1.bf16.msk.msra.mxu0 %vm1777_vm11, %v2244_v25  ;;  %vm1715_vm14 = vmpackc.low %vm530_vm7, %vm528_vm6  ;;  %vm598_vm6 = vcmp.eq.s32.totalorder %v2720_v56, %v2802_v40  ;;  %vm595_vm11 = vcmp.eq.s32.totalorder %v2717_v55, %v2804_v36 }
  0xaf   : >> { %1716 = vmatprep.subr.msk.bf16.mxu1 %vm1715_vm14, %v2244_v25  ;;  %vm1779_vm1 = vmpackc.low %vm594_vm10, %vm592_vm9  ;;  %vm533_vm9 = vcmp.eq.s32.totalorder %v3436_v19, %v2804_v36  ;;  %vm536_vm14 = vcmp.eq.s32.totalorder %v2616_v23, %v2802_v40 }
  0xb0   : >> { %1780 = vmatprep.subr.msk.bf16.mxu0 %vm1779_vm1, %v2244_v25  ;;  %vm1717_vm4 = vmpackc.low %vm529_vm13, %vm527_vm12  ;;  %vm597_vm12 = vcmp.eq.s32.totalorder %v2720_v56, %v2804_v36  ;;  %vm600_vm1 = vcmp.eq.s32.totalorder %v2723_v57, %v2802_v40 }
  0xb1   : >> { %1718 = vmatpush1.bf16.msk.msra.mxu1 %vm1717_vm4, %v2244_v25  ;;  %vm1781_vm7 = vmpackc.low %vm593_vm0, %vm591_vm15  ;;  %vm538_vm15 = vcmp.eq.s32.totalorder %v2619_v24, %v2802_v40  ;;  %vm535_vm4 = vcmp.eq.s32.totalorder %v2616_v23, %v2804_v36 }
  0xb2   : >> { %1782 = vmatpush1.bf16.msk.msra.mxu0 %vm1781_vm7, %v2244_v25  ;;  %vm1719_vm10 = vmpackc.low %vm534_vm3, %vm532_vm2  ;;  %vm602_vm2 = vcmp.eq.s32.totalorder %v2726_v58, %v2802_v40  ;;  %vm599_vm7 = vcmp.eq.s32.totalorder %v2723_v57, %v2804_v36 }
  0xb3   : >> { %1720 = vmatprep.subr.msk.bf16.mxu1 %vm1719_vm10, %v2244_v25  ;;  %vm1783_vm13 = vmpackc.low %vm598_vm6, %vm596_vm5  ;;  %vm537_vm5 = vcmp.eq.s32.totalorder %v2619_v24, %v2804_v36  ;;  %vm540_vm10 = vcmp.eq.s32.totalorder %v2633_v27, %v2802_v40 }
  0xb4   : >> { %1784 = vmatprep.subr.msk.bf16.mxu0 %vm1783_vm13, %v2244_v25  ;;  %vm1721_vm0 = vmpackc.low %vm533_vm9, %vm531_vm8  ;;  %vm601_vm8 = vcmp.eq.s32.totalorder %v2726_v58, %v2804_v36  ;;  %vm604_vm13 = vcmp.eq.s32.totalorder %v2729_v59, %v2802_v40 }
  0xb5   : >> { %1722 = vmatpush1.bf16.msk.msra.mxu1 %vm1721_vm0, %v2244_v25  ;;  %vm1785_vm3 = vmpackc.low %vm597_vm12, %vm595_vm11  ;;  %vm542_vm11 = vcmp.eq.s32.totalorder %v2636_v28, %v2802_v40  ;;  %vm539_vm0 = vcmp.eq.s32.totalorder %v2633_v27, %v2804_v36 }
  0xb6   : >> { %1786 = vmatpush1.bf16.msk.msra.mxu0 %vm1785_vm3, %v2244_v25  ;;  %vm1723_vm6 = vmpackc.low %vm538_vm15, %vm536_vm14  ;;  %vm606_vm14 = vcmp.eq.s32.totalorder %v2732_v60, %v2802_v40  ;;  %vm603_vm3 = vcmp.eq.s32.totalorder %v2729_v59, %v2804_v36 }
  0xb7   : >> { %1724 = vmatprep.subr.msk.bf16.mxu1 %vm1723_vm6, %v2244_v25  ;;  %vm1787_vm9 = vmpackc.low %vm602_vm2, %vm600_vm1  ;;  %vm541_vm1 = vcmp.eq.s32.totalorder %v2636_v28, %v2804_v36  ;;  %vm544_vm6 = vcmp.eq.s32.totalorder %v2639_v29, %v2802_v40 }
  0xb8   : >> { %1788 = vmatprep.subr.msk.bf16.mxu0 %vm1787_vm9, %v2244_v25  ;;  %vm1725_vm12 = vmpackc.low %vm537_vm5, %vm535_vm4  ;;  %vm605_vm4 = vcmp.eq.s32.totalorder %v2732_v60, %v2804_v36  ;;  %vm608_vm9 = vcmp.eq.s32.totalorder %v2735_v61, %v2802_v40 }
  0xb9   : >> { %1726 = vmatpush1.bf16.msk.msra.mxu1 %vm1725_vm12, %v2244_v25  ;;  %vm1789_vm15 = vmpackc.low %vm601_vm8, %vm599_vm7  ;;  %vm546_vm7 = vcmp.eq.s32.totalorder %v2642_v30, %v2802_v40  ;;  %vm543_vm12 = vcmp.eq.s32.totalorder %v2639_v29, %v2804_v36 }
  0xba   : >> { %1790 = vmatpush1.bf16.msk.msra.mxu0 %vm1789_vm15, %v2244_v25  ;;  %vm1727_vm2 = vmpackc.low %vm542_vm11, %vm540_vm10  ;;  %vm610_vm10 = vcmp.eq.s32.totalorder %v2738_v62, %v2802_v40  ;;  %vm607_vm15 = vcmp.eq.s32.totalorder %v2735_v61, %v2804_v36 }
  0xbb   : >> { %1728 = vmatprep.subr.msk.bf16.mxu1 %vm1727_vm2, %v2244_v25  ;;  %vm1791_vm5 = vmpackc.low %vm606_vm14, %vm604_vm13  ;;  %vm545_vm13 = vcmp.eq.s32.totalorder %v2642_v30, %v2804_v36  ;;  %vm548_vm2 = vcmp.eq.s32.totalorder %v2645_v31, %v2802_v40 }
  0xbc   : >> { %1792 = vmatprep.subr.msk.bf16.mxu0 %vm1791_vm5, %v2244_v25  ;;  %vm1729_vm8 = vmpackc.low %vm541_vm1, %vm539_vm0  ;;  %vm609_vm0 = vcmp.eq.s32.totalorder %v2738_v62, %v2804_v36  ;;  %vm612_vm5 = vcmp.eq.s32.totalorder %v2741_v63, %v2802_v40 }
  0xbd   : >> { %1730 = vmatpush1.bf16.msk.msra.mxu1 %vm1729_vm8, %v2244_v25  ;;  %vm1793_vm11 = vmpackc.low %vm605_vm4, %vm603_vm3  ;;  %vm550_vm3 = vcmp.eq.s32.totalorder %v2648_v32, %v2802_v40  ;;  %vm547_vm8 = vcmp.eq.s32.totalorder %v2645_v31, %v2804_v36 }
  0xbe   : >> { %1794 = vmatpush1.bf16.msk.msra.mxu0 %vm1793_vm11, %v2244_v25  ;;  %vm1731_vm14 = vmpackc.low %vm546_vm7, %vm544_vm6  ;;  %vm614_vm6 = vcmp.eq.s32.totalorder %v3455_v0, %v2802_v40  ;;  %vm611_vm11 = vcmp.eq.s32.totalorder %v2741_v63, %v2804_v36 }
  0xbf   : >> { %1732 = vmatprep.subr.msk.bf16.mxu1 %vm1731_vm14, %v2244_v25  ;;  %vm1795_vm1 = vmpackc.low %vm610_vm10, %vm608_vm9  ;;  %vm549_vm9 = vcmp.eq.s32.totalorder %v2648_v32, %v2804_v36  ;;  %vm552_vm14 = vcmp.eq.s32.totalorder %v2651_v33, %v2802_v40 }
  0xc0   : >> { %1796 = vmatprep.subr.msk.bf16.mxu0 %vm1795_vm1, %v2244_v25  ;;  %vm1733_vm4 = vmpackc.low %vm545_vm13, %vm543_vm12  ;;  %vm613_vm12 = vcmp.eq.s32.totalorder %v3455_v0, %v2804_v36  ;;  %vm616_vm1 = vcmp.eq.s32.totalorder %v3441_v14, %v2802_v40 }
  0xc1   : >> { %1734 = vmatpush1.bf16.msk.msra.mxu1 %vm1733_vm4, %v2244_v25  ;;  %vm1797_vm7 = vmpackc.low %vm609_vm0, %vm607_vm15  ;;  %vm554_vm15 = vcmp.eq.s32.totalorder %v2654_v34, %v2802_v40  ;;  %vm551_vm4 = vcmp.eq.s32.totalorder %v2651_v33, %v2804_v36 }
  0xc2   : >> { %1798 = vmatpush1.bf16.msk.msra.mxu0 %vm1797_vm7, %v2244_v25  ;;  %vm1735_vm10 = vmpackc.low %vm550_vm3, %vm548_vm2  ;;  %vm618_vm2 = vcmp.eq.s32.totalorder %v3440_v15, %v2802_v40  ;;  %vm615_vm7 = vcmp.eq.s32.totalorder %v3441_v14, %v2804_v36 }
  0xc3   : >> { %1736 = vmatprep.subr.msk.bf16.mxu1 %vm1735_vm10, %v2244_v25  ;;  %vm1799_vm13 = vmpackc.low %vm614_vm6, %vm612_vm5  ;;  %vm553_vm5 = vcmp.eq.s32.totalorder %v2654_v34, %v2804_v36  ;;  %vm556_vm10 = vcmp.eq.s32.totalorder %v2657_v35, %v2802_v40 }
  0xc4   : >> { %1800 = vmatprep.subr.msk.bf16.mxu0 %vm1799_vm13, %v2244_v25  ;;  %vm1737_vm0 = vmpackc.low %vm549_vm9, %vm547_vm8  ;;  %vm617_vm8 = vcmp.eq.s32.totalorder %v3440_v15, %v2804_v36  ;;  %vm620_vm13 = vcmp.eq.s32.totalorder %v3460_v38, %v2802_v40 }
  0xc5   : >> { %1738 = vmatpush1.bf16.msk.msra.mxu1 %vm1737_vm0, %v2244_v25  ;;  %vm1801_vm3 = vmpackc.low %vm613_vm12, %vm611_vm11  ;;  %vm558_vm11 = vcmp.eq.s32.totalorder %v3458_v26, %v2802_v40  ;;  %vm555_vm0 = vcmp.eq.s32.totalorder %v2657_v35, %v2804_v36  ;;  %v3462_v26 = vld [vmem:[#allocation45_spill] sm:$0xff] }
  0xc6   : >> { %1802 = vmatpush1.bf16.msk.msra.mxu0 %vm1801_vm3, %v2244_v25  ;;  %vm1739_vm6 = vmpackc.low %vm554_vm15, %vm552_vm14  ;;  %vm622_vm14 = vcmp.eq.s32.totalorder %v3461_v39, %v2802_v40  ;;  %vm619_vm3 = vcmp.eq.s32.totalorder %v3460_v38, %v2804_v36  ;;  %v3463_v0 = vmov %v3462_v26 }
  0xc7   : >> { %1740 = vmatprep.subr.msk.bf16.mxu1 %vm1739_vm6, %v2244_v25  ;;  %vm1803_vm9 = vmpackc.low %vm618_vm2, %vm616_vm1  ;;  %vm557_vm1 = vcmp.eq.s32.totalorder %v3459_v37, %v2804_v36  ;;  %vm560_vm6 = vcmp.eq.s32.totalorder %v3462_v26, %v2802_v40  ;;  %v3467_v26 = vld [vmem:[#allocation47_spill] sm:$0xff] }
  0xc8   : >> { %1804 = vmatprep.subr.msk.bf16.mxu0 %vm1803_vm9, %v2244_v25  ;;  %vm1741_vm12 = vmpackc.low %vm553_vm5, %vm551_vm4  ;;  %vm621_vm4 = vcmp.eq.s32.totalorder %v3461_v39, %v2804_v36  ;;  %vm624_vm9 = vcmp.eq.s32.totalorder %v3465_v2, %v2802_v40  ;;  %v3468_v4 = vmov %v3467_v26 }
  0xc9   : >> { %1742 = vmatpush1.bf16.msk.msra.mxu1 %vm1741_vm12, %v2244_v25  ;;  %vm1805_vm15 = vmpackc.low %vm617_vm8, %vm615_vm7  ;;  %vm562_vm7 = vcmp.eq.s32.totalorder %v3464_v1, %v2802_v40  ;;  %vm559_vm12 = vcmp.eq.s32.totalorder %v3463_v0, %v2804_v36  ;;  %v3469_v0 = vld [vmem:[#allocation48_spill] sm:$0xff] }
  0xca   : >> { %1806 = vmatpush1.bf16.msk.msra.mxu0 %vm1805_vm15, %v2244_v25  ;;  %vm1743_vm2 = vmpackc.low %vm558_vm11, %vm556_vm10  ;;  %vm626_vm10 = vcmp.eq.s32.totalorder %v3466_v3, %v2802_v40  ;;  %vm623_vm15 = vcmp.eq.s32.totalorder %v3465_v2, %v2804_v36  ;;  %v3471_v2 = vld [vmem:[#allocation57_spill] sm:$0xff] }
  0xcb   : >> { %1744 = vmatprep.subr.msk.bf16.mxu1 %vm1743_vm2, %v2244_v25  ;;  %vm1807_vm5 = vmpackc.low %vm622_vm14, %vm620_vm13  ;;  %vm561_vm13 = vcmp.eq.s32.totalorder %v3464_v1, %v2804_v36  ;;  %vm564_vm2 = vcmp.eq.s32.totalorder %v3467_v26, %v2802_v40  ;;  %v3470_v1 = vld [vmem:[#allocation56_spill] sm:$0xff]  ;;  %v1685_v26 = vcombine.low %v3435_v20, %v2613_v22  ;;  %v1202_v22 = vld [vmem:[%s3311_s4 + $0x8] sm:$0xff] (%p480_p12) }
  0xcc   : >> { %1808 = vmatprep.subr.msk.bf16.mxu0 %vm1807_vm5, %v2244_v25  ;;  %vm1745_vm8 = vmpackc.low %vm557_vm1, %vm555_vm0  ;;  %vm625_vm0 = vcmp.eq.s32.totalorder %v3466_v3, %v2804_v36  ;;  %vm628_vm5 = vcmp.eq.s32.totalorder %v3470_v1, %v2802_v40 }
  0xcd   : >> { %1746 = vmatpush1.bf16.msk.msra.mxu1 %vm1745_vm8, %v2244_v25  ;;  %vm1809_vm11 = vmpackc.low %vm621_vm4, %vm619_vm3  ;;  %vm566_vm3 = vcmp.eq.s32.totalorder %v3469_v0, %v2802_v40  ;;  %vm563_vm8 = vcmp.eq.s32.totalorder %v3468_v4, %v2804_v36 }
  0xce   : >> { %1810 = vmatpush1.bf16.msk.msra.mxu0 %vm1809_vm11, %v2244_v25  ;;  %vm1747_vm14 = vmpackc.low %vm562_vm7, %vm560_vm6  ;;  %vm630_vm6 = vcmp.eq.s32.totalorder %v3471_v2, %v2802_v40  ;;  %vm627_vm11 = vcmp.eq.s32.totalorder %v3470_v1, %v2804_v36  ;;  %v1683_v40 = vcombine.low %v3439_v16, %v3434_v21 }
  0xcf   : >> { %1748 = vmatprep.subr.msk.bf16.mxu1 %vm1747_vm14, %v2244_v25  ;;  %vm1811_vm1 = vmpackc.low %vm626_vm10, %vm624_vm9  ;;  %vm565_vm9 = vcmp.eq.s32.totalorder %v3469_v0, %v2804_v36  ;;  %v3472_v0 = vld [vmem:[#allocation42_spill] sm:$0xff] }
  0xd0   : >> { %1812 = vmatprep.subr.msk.bf16.mxu0 %vm1811_vm1, %v2244_v25  ;;  %vm1749_vm4 = vmpackc.low %vm561_vm13, %vm559_vm12  ;;  %vm629_vm12 = vcmp.eq.s32.totalorder %v3471_v2, %v2804_v36  ;;  %v1688_v1 = vcombine.high %v3472_v0, %v3472_v0  ;;  %v3473_v36 = vld [vmem:[#allocation43_spill] sm:$0xff]  ;;  %v1687_v3 = vcombine.low %v3472_v0, %v3472_v0 }
  0xd1   : >> { %1750 = vmatpush1.bf16.msk.msra.mxu1 %vm1749_vm4, %v2244_v25  ;;  %vm1813_vm7 = vmpackc.low %vm625_vm0, %vm623_vm15  ;;  %v1690_v2 = vcombine.high %v3473_v36, %v3473_v36  ;;  %v1689_v4 = vcombine.low %v3473_v36, %v3473_v36  ;;  %vm1099_vm0 = vcmask (%p480_p12), 64512  }
  0xd2   : >> { %1814 = vmatpush1.bf16.msk.msra.mxu0 %vm1813_vm7, %v2244_v25  ;;  %vm1751_vm10 = vmpackc.low %vm566_vm3, %vm564_vm2 }
  0xd3   : >> { %1752 = vmatprep.subr.msk.bf16.mxu1 %vm1751_vm10, %v2244_v25  ;;  %vm1815_vm13 = vmpackc.low %vm630_vm6, %vm628_vm5 }
  0xd4   : >> { %1816 = vmatprep.subr.msk.bf16.mxu0 %vm1815_vm13, %v2244_v25  ;;  %vm1753_vm14 = vmpackc.low %vm565_vm9, %vm563_vm8 }
  0xd5   : >> { %1754 = vmatpush1.bf16.msk.msra.mxu1 %vm1753_vm14, %v2244_v25  ;;  %vm1817_vm15 = vmpackc.low %vm629_vm12, %vm627_vm11 }
  0xd6   : >> { %1818 = vmatpush1.bf16.msk.msra.mxu0 %vm1817_vm15, %v2244_v25 }
  0xd8   : >> { %1018 = vmatmul.mubr.bf16.vlgmr.msra.gmra.mrb[0].mxu1 %v1683_v40 }
  0xd9   : >> { %1069 = vmatmul.mubr.bf16.vlgmr.msra.gmra.mrb[0].mxu0 %v1685_v26  ;;  %1027 = vmatprep.mubr.bf16.mxu1 %v1688_v1 }
  0xda   : >> { %1078 = vmatprep.mubr.bf16.mxu0 %v1690_v2 }
  0xe0   : >> { %1028 = vmatmul.mubr.bf16.gmra.mrb[4].mxu1 %v1687_v3 }
  0xe1   : >> { %1079 = vmatmul.mubr.bf16.gmra.mrb[4].mxu0 %v1689_v4 }
 0x1ab   : >> { %v1019_v5 = vpop.f32.mrb[0].mxu1 }
 0x1ac   : >> { %v1070_v6 = vpop.f32.mrb[0].mxu0  ;;  %v1021_v7 = vpop.f32.mrb[1].mxu1 }
 0x1ad   : >> { %v1071_v8 = vadd.f32 %v1070_v6, %v1019_v5  ;;  %v1072_v25 = vpop.f32.mrb[1].mxu0  ;;  %v1023_v9 = vpop.f32.mrb[2].mxu1 }
 0x1ae   : >> { %v1073_v10 = vadd.f32 %v1072_v25, %v1021_v7  ;;  %v1074_v11 = vpop.f32.mrb[2].mxu0  ;;  %v1025_v40 = vpop.f32.mrb[3].mxu1  ;;  %v3474_v7 = vld [vmem:[#allocation59_spill] sm:$0xff]  ;;  %v3475_v25 = vld [vmem:[#allocation58_spill] sm:$0xff] }
 0x1af   : >> { %v1075_v26 = vadd.f32 %v1074_v11, %v1023_v9  ;;  %v1076_v1 = vpop.f32.mrb[3].mxu0  ;;  %v3478_v11 = vld [vmem:[#allocation35_spill] sm:$0xff] (%p480_p12) }
 0x1b0   : >> { %v1077_v2 = vadd.f32 %v1076_v1, %v1025_v40  ;;  %1112 = vmatprep.subr.mxu0 (%p480_p12), %v3478_v11  ;;  %1842 = vmatprep.subr.mxu1 (%p480_p12), %v3478_v11 }
 0x1b3   : >> { %v1029_v12 = vpop.f32.mrb[4].mxu1 }
 0x1b4   : >> { %v1080_v13 = vpop.f32.mrb[4].mxu0  ;;  %v1031_v0 = vpop.f32.mrb[5].mxu1 }
 0x1b5   : >> { %v1081_v14 = vadd.f32 %v1080_v13, %v1029_v12  ;;  %v1082_v15 = vpop.f32.mrb[5].mxu0  ;;  %v1033_v16 = vpop.f32.mrb[6].mxu1  ;;  %v3479_v12 = vld [vmem:[#allocation34_spill] sm:$0xff] (%p480_p12) }
 0x1b6   : >> { %v1083_v3 = vadd.f32 %v1082_v15, %v1031_v0  ;;  %v1084_v4 = vpop.f32.mrb[6].mxu0  ;;  %v1034_v17 = vpop.f32.mrb[7].mxu1  ;;  %1113 = vmatpush1.msra.mxu0 (%p480_p12), %v3479_v12  ;;  %v1096_v15 = vld [vmem:[%s3310_s3 + $0x8] sm:$0xff] (%p480_p12)  ;;  %v1290_v16 = vld [vmem:[%s3312_s5] sm:$0xff] (%p480_p12)  ;;  %1843 = vmatpush1.msra.mxu1 (%p480_p12), %v3479_v12 }
 0x1b7   : >> { %v1087_v18 = vadd.f32 %v1081_v14, %v1075_v26  ;;  %v1085_v19 = vpop.f32.mrb[7].mxu0  ;;  %v2245_v14 = vmov (%p480_p12), 0.0   ;;  %v2246_v17 = vmov (%p480_p12), 0  }
 0x1b8   : >> { %v1088_v5 = vadd.f32 %v1083_v3, %v1077_v2  ;;  %482 = sbr.rel (!%p480_p12) target bundleno = 138 (0x8a), region = 130  ;;  %1176 = vmatprep.mubr.f32.mxu0 (%p480_p12), %v2245_v14  ;;  %1182 = vmatprep.mubr.f32.mxu1 (%p480_p12), %v2245_v14  ;;  %v1201_v19 = vld [vmem:[%s3311_s4] sm:$0xff] (%p480_p12) }
 0x1b9   : >> { %v1089_v6 = vadd.f32 %v1087_v18, %v1071_v8  ;;  %v1095_v8 = vld [vmem:[%s3310_s3] sm:$0xff] (%p480_p12)  ;;  %1820 = vmatmul.mubr.msk.f32.vlgmr.msra.gmra.mrb[0].mxu1 (%p480_p12), %vm1099_vm0, %v1096_v15  ;;  %1995 = vset.pattern.permute.xlu0 (%p480_p12), %v2246_v17  ;;  %v1097_v18 = vld [vmem:[%s3310_s3 + $0x10] sm:$0xff] (%p480_p12) }
 0x1ba   : >> { %v1090_v20 = vadd.f32 %v1088_v5, %v1073_v10  ;;  %1819 = vmatmul.mubr.msk.f32.vlgmr.msra.gmra.mrb[0].mxu0 (%p480_p12), %vm1099_vm0, %v1095_v8  ;;  %1188 = vmatprep.mubr.f32.mxu1 (%p480_p12), %v2245_v14 }
 0x1bb   : >> { %v1091_v21 = vmax.f32 %v3474_v7, %v1089_v6   ;;  %1273 = vmatprep.mubr.f32.mxu0 (%p480_p12), %v2245_v14  ;;  %1294 = vperm.xlu0 (%p480_p12), %1995, %v1290_v16  }
 0x1bc   : >> { %v1092_v9 = vmax.f32 %v3475_v25, %v1090_v20   ;;  %v1291_v20 = vld [vmem:[%s3312_s5 + $0x8] sm:$0xff] (%p480_p12) }
 0x1bd   : >> { %v3477_v25 = vmov %v1091_v21  ;;  %v1093_v13 = vsub.f32 (%p480_p12), %v1091_v21, %v3479_v12  ;;  %1821 = vmatmul.mubr.msk.f32.gmra.mrb[2].mxu1 (%p480_p12), %vm1099_vm0, %v1097_v18  ;;  %v1098_v21 = vld [vmem:[%s3310_s3 + $0x18] sm:$0xff] (%p480_p12) }
 0x1be   : >> { %v3476_v26 = vmov %v1092_v9  ;;  %v1094_v10 = vsub.f32 (%p480_p12), %v1092_v9, %v3478_v11  ;;  %1194 = vmatprep.mubr.f32.mxu1 (%p480_p12), %v2245_v14 }
 0x1bf   : > { %1299 = vperm.xlu0 %1995, %v1291_v20  }
 0x1c0   : > { %1209 = vmatprep.subr.mxu0 %v1094_v10 }
 0x1c1   : > { %1210 = vmatpush1.msra.mxu0 %v1093_v13  ;;  %1822 = vmatmul.mubr.msk.f32.gmra.mrb[4].mxu1 %vm1099_vm0, %v1098_v21 }
 0x1c2   : > { %1823 = vmatmul.mubr.msk.f32.vlgmr.msra.gmra.mrb[0].mxu0 %vm1099_vm0, %v1201_v19 }
 0x1c3   : > { %1279 = vmatprep.mubr.f32.mxu0 %v2245_v14 }
 0x1c6   : > { %1824 = vmatmul.mubr.msk.f32.gmra.mrb[2].mxu0 %vm1099_vm0, %v1202_v22 }
 0x23a   : > { %v1295_v27 = vpop.permute.xlu0 %1294 }
 0x23e   : > { %v1300_v46 = vpop.permute.xlu0 %1299 }
 0x28c   : > { %v1184_v23 = vpop.f32.mrb[0].mxu1 }
 0x28d   : > { %v1186_v24 = vpop.f32.mrb[1].mxu1 }
 0x290   : > { %v1190_v28 = vpop.f32.mrb[2].mxu1 }
 0x291   : > { %1314 = vst [vmem:[%s2776_s19] sm:$0xff] %v1190_v28  ;;  %v1192_v30 = vpop.f32.mrb[3].mxu1 }
 0x292   : > { %1315 = vst [vmem:[%s2776_s19 + $0x8] sm:$0xff] %v1192_v30 }
 0x294   : > { %v1196_v35 = vpop.f32.mrb[4].mxu1 }
 0x295   : > { %v1275_v29 = vpop.f32.mrb[0].mxu0  ;;  %1316 = vst [vmem:[%s2776_s19 + $0x10] sm:$0xff] %v1196_v35  ;;  %v1198_v43 = vpop.f32.mrb[5].mxu1 }
 0x296   : > { %v1302_v31 = vadd.f32 %v1295_v27, %v1275_v29  ;;  %v1277_v32 = vpop.f32.mrb[1].mxu0  ;;  %1317 = vst [vmem:[%s2776_s19 + $0x18] sm:$0xff] %v1198_v43 }
 0x297   : > { %v1303_v33 = vadd.f32 %v1295_v27, %v1277_v32 }
 0x298   : > { %v1306_v34 = vmax.f32 %v1302_v31, 0.0 }
 0x299   : > { %v1307_v41 = vmax.f32 %v1303_v33, 0.0  ;;  %v1281_v42 = vpop.f32.mrb[2].mxu0 }
 0x29a   : > { %1310 = vst [vmem:[%s2772_s6] sm:$0xff] %v1306_v34  ;;  %v1288_v44 = vadd.f32 %v1281_v42, %v1184_v23  ;;  %v1283_v45 = vpop.f32.mrb[3].mxu0 }
 0x29b   : > { %1311 = vst [vmem:[%s2772_s6 + $0x8] sm:$0xff] %v1307_v41  ;;  %v1289_v47 = vadd.f32 %v1283_v45, %v1186_v24 }
 0x29c   : > { %2069 = shalt.err (!%p2066_p6)
}
 0x29d   : > { %s2070_s19 = scalar_lea.hbm %s3196_s24, 512  ;;  %s2074_s8 = scalar_lea.hbm %s3480_s7, 2048 }
 0x29e   : > { %p2071_p11 = scmp.ne.s32.totalorder %s3196_s24, %s2070_s19  ;;  %p2075_p9 = scmp.lt.u32.totalorder %s3196_s24, %s3480_s7 }
 0x29f   : > { %p2076_p0 = scmp.lt.u32.totalorder %s2074_s8, %s2070_s19  ;;  %p2078_p4 = scmp.lt.u32.totalorder %s2070_s19, %s3196_s24 }
 0x2a0   : > { %p2072_p13 = pnand %p2071_p11, %p3482_p3 }
 0x2a1   : > { %p2077_p12 = por %p2076_p0, %p2075_p9 }
 0x2a2   : > { %p2073_p5 = pneg %p2072_p13 }
 0x2a3   : > { %p2079_p2 = por %p2078_p4, %p2077_p12 }
 0x2a5   : > { %p2080_p10 = pnand %p2079_p2, %p2073_p5 }
 0x2a7   : > { %2083 = shalt.err (!%p2080_p10)
}
 0x2a8   : > { %s2248_s23 = smov 256   ;;  %s2249_s30 = smov 512   ;;  %v1304_v48 = vadd.f32 %v1300_v46, %v1288_v44  ;;  %v1305_v49 = vadd.f32 %v1300_v46, %v1289_v47 }
 0x2a9   : > { %s2250_s15 = smov 16   ;;  %s1339_s19 = sshll.u32 %s2772_s6, 4  ;;  %s3239_s19 = int_to_ptr.vmem [resolvable:$true] %s1339_s19 }
 0x2aa   : > { %1856 = dma.vmem_to_hbm [thread:$0]  (%p3482_p3), %s3198_s22, 512, %s3196_s24, %s1324_s29, %s2248_s23, %s2249_s30, %s2250_s15   ;;  %v1308_v50 = vmax.f32 %v1304_v48, 0.0  ;;  %v1309_v51 = vmax.f32 %v1305_v49, 0.0 }
 0x2ab   : > { %s3483_s8 = sld [smem:[#allocation61_spill]]  ;;  %s1319_s0 = scalar_lea.sflag [#allocation4], %s2525_s14 }
 0x2ac   : > { %1312 = vst [vmem:[%s2772_s6 + $0x10] sm:$0xff] %v1308_v50  ;;  %1313 = vst [vmem:[%s2772_s6 + $0x18] sm:$0xff] %v1309_v51  ;;  %s2084_s22 = scalar_lea.vmem %s3239_s19, 512  ;;  %s2251_s24 = smov [#allocation7]  }
 0x2ad   : > { %p2085_p7 = scmp.ne.s32.totalorder %s3239_s19, %s2084_s22  ;;  %s2088_s18 = sshll.u32 %s2251_s24, 4  ;;  %s2089_s18 = int_to_ptr.vmem [resolvable:$false] %s2088_s18 }
 0x2ae   : > { %s2090_s29 = scalar_lea.vmem %s2089_s18, 1024  ;;  %p2091_p6 = scmp.lt.s32.totalorder %s3239_s19, %s2089_s18 }
 0x2af   : > { %p2086_p1 = pnand %p2085_p7, %p3482_p3  ;;  %p2092_p11 = scmp.lt.s32.totalorder %s2090_s29, %s2084_s22 }
 0x2b1   : > { %s3484_s20 = smov %s3483_s8  ;;  %s3237_s21 = scalar_lea.hbm %s3483_s8, %s1829_s27 }
 0x2b2   : > { %p2087_p8 = pneg %p2086_p1  ;;  %p2093_p13 = por %p2092_p11, %p2091_p6 }
 0x2b4   : > { %p2094_p5 = pnand %p2093_p13, %p2087_p8 }
 0x2b6   : > { %2097 = shalt.err (!%p2094_p5)
}
 0x2b7   : > { %s2098_s6 = scalar_lea.hbm %s3237_s21, 512  ;;  %s2102_s13 = scalar_lea.hbm %s3484_s20, 2048 }
 0x2b8   : > { %p2099_p9 = scmp.ne.s32.totalorder %s3237_s21, %s2098_s6  ;;  %p2103_p4 = scmp.lt.u32.totalorder %s3237_s21, %s3484_s20 }
 0x2b9   : > { %p2104_p2 = scmp.lt.u32.totalorder %s2102_s13, %s2098_s6  ;;  %p2106_p7 = scmp.lt.u32.totalorder %s2098_s6, %s3237_s21 }
 0x2ba   : > { %p2100_p0 = pnand %p2099_p9, %p3482_p3 }
 0x2bb   : > { %p2105_p10 = por %p2104_p2, %p2103_p4 }
 0x2bc   : > { %p2101_p12 = pneg %p2100_p0 }
 0x2bd   : > { %p2107_p1 = por %p2106_p7, %p2105_p10 }
 0x2bf   : > { %p2108_p8 = pnand %p2107_p1, %p2101_p12 }
 0x2c1   : > { %2111 = shalt.err (!%p2108_p8)
}
 0x2c2   : > { %1855 = dma.vmem_to_hbm [thread:$0]  (%p3482_p3), %s3239_s19, 512, %s3237_s21, %s1319_s0, %s2248_s23, %s2249_s30, %s2250_s15  }
 0x2c3 PF: > { %s3485_s22 = sld [smem:[#allocation14_spill]]  ;;  %p1874_p6 = scmp.ge.s32.totalorder %s2226_s11, 2 }
 0x2c4   : > { %p3486_p11 = scmp.ne.s32.totalorder %s3389_s16, 0 }
 0x2c6   : > { %p1867_p13 = pnand %p1874_p6, %p3486_p11 }
 0x2c9   : > { %s1372_s18 = sand.u32 1, %s3485_s22  }
 0x2ca   : > { %s1373_s29 = scalar_lea.sflag [#allocation4], %s1372_s18 }
 0x2cb   : > { %2177 = dma.done.wait (!%p1867_p13), %s1373_s29, 512  }
 0x2cc   : > { %2179 = vsyncadd (!%p1867_p13), %s1373_s29, 4294966784  ;;  %s1382_s17 = scalar_lea.sflag [#allocation9], %s1372_s18 }
 0x2cd   : > { %2181 = dma.done.wait (!%p1867_p13), %s1382_s17, 512  }
 0x2ce   : > { %2183 = vsyncadd (!%p1867_p13), %s1382_s17, 4294966784  ;;  %s30_s11 = sadd.s32 1, %s2226_s11   ;;  %s3487_s0 = sld [smem:[#allocation18_spill]] }
 0x2cf   : > { %p27_p5 = scmp.ge.s32.totalorder %s30_s11, 6   ;;  %s3488_s14 = sld [smem:[#allocation15_spill]] }
 0x2d0   : > { %s3489_s29 = sld [smem:[#allocation19_spill]]  ;;  %s3490_s23 = sld [smem:[#allocation16_spill]] }
 0x2d1   : > { %s3491_s16 = sld [smem:[#allocation17_spill]]  ;;  %s3492_s24 = smov %s2190_s25 }
 0x2d2   : > { %s3493_s25 = smov %s2194_s26  ;;  %s3495_s27 = smov %s2202_s28 }
 0x2d3   : > { %s3497_s30 = smov %s2218_s9  ;;  %s3498_s8 = smov %s2222_s10 }
 0x2d4   : > { %s3494_s26 = smov %s3487_s0  ;;  %29 = sbr.rel (!%p27_p5) target bundleno = 17 (0x11), region = 141 }
 0x2d5   : > { %s3496_s28 = smov %s3488_s14 }
 0x2d6   : > { %s3499_s9 = smov %s3490_s23 }
 0x2d7   : > { %s3500_s10 = smov %s3491_s16 }
 0x2db   :  { %1387 = vsyncpa [#allocation3], 1 }
 0x2dc   :  { %1389 = vsyncpa [#allocation3 + $0x1], 1 }
 0x2dd   :  { %1390 = vsyncpa [#allocation6], 1 }
 0x2de   :  { %1392 = vsyncpa [#allocation6 + $0x1], 1 }
 0x2df   :  { %1393 = vsyncpa [#allocation4], 1 }
 0x2e0   :  { %1395 = vsyncpa [#allocation4 + $0x1], 1 }
 0x2e1   :  { %1396 = vsyncpa [#allocation9], 1 }
 0x2e2   :  { %1398 = vsyncpa [#allocation9 + $0x1], 1 }

</bundles_post_ra>
